<compile_context>
chip_gen: v6e
topology: v6e:2x2x1
jax: 0.10.0
libtpu: 0.0.40
codegen_flags: <defaults>
</compile_context>

<pallas_src>
import jax
import jax.numpy as jnp
from jax.experimental import pallas as pl
from jax.experimental.pallas import tpu as pltpu

SEQ = 1104
DIM = 80
_LANES = 128


def _add_pos_kernel(x_ref, pe_ref, o_ref):
    # x_ref:  (TB, rows, lanes)  current batch tile
    # pe_ref: (1,  rows, lanes)  shared positional embedding (same block each step)
    # Single lane-dense VPU add with a leading-axis broadcast.
    o_ref[...] = x_ref[...] + pe_ref[...]


def _tpu_kind():
    try:
        return jax.devices()[0].device_kind.lower()
    except Exception:
        return ""


def learned_positional_encoding(x, position_embeddings, *, in_place=False):
    """x: (B, S, D); position_embeddings: (1, S, D). Returns x + pe."""
    B, S, D = x.shape
    assert position_embeddings.shape == (1, S, D)

    # Match PyTorch type promotion, then run a same-dtype add in the kernel.
    out_dtype = jnp.result_type(x.dtype, position_embeddings.dtype)
    if x.dtype != out_dtype:
        x = x.astype(out_dtype)
    if position_embeddings.dtype != out_dtype:
        position_embeddings = position_embeddings.astype(out_dtype)

    # (B, S, D) -> (B, rows, 128) when S*D is lane-divisible (1104*80 = 690*128),
    # keeping the sublane axis dense independent of the batch tile size.
    N = S * D
    if N % _LANES == 0:
        rows, lanes = N // _LANES, _LANES
    else:
        rows, lanes = S, D  # fallback layout (still correct)
    x3d = x.reshape(B, rows, lanes)
    pe3d = position_embeddings.reshape(1, rows, lanes)

    # Generation-specific batch tile / scoped-VMEM limit.
    kind = _tpu_kind()
    is_v7 = ("v7" in kind) or ("7x" in kind)
    if is_v7:
        # 2 TensorCores, 64 MiB VMEM/TC: ensure >= 2 grid steps, cap tile at 16.
        tb_cap = max(1, min(16, pl.cdiv(B, 2)))
        vmem_bytes = 32 * 1024 * 1024
    else:
        # Single TC, 128 MiB physical VMEM: bigger tiles amortize per-step overhead.
        tb_cap = 32
        vmem_bytes = 64 * 1024 * 1024
    TB = min(B, tb_cap)
    grid = (pl.cdiv(B, TB),)

    def call(pe_mode):
        if pe_mode is not None:
            pe_spec = pl.BlockSpec((1, rows, lanes), lambda b: (0, 0, 0),
                                   pipeline_mode=pe_mode)
        else:
            pe_spec = pl.BlockSpec((1, rows, lanes), lambda b: (0, 0, 0))
        return pl.pallas_call(
            _add_pos_kernel,
            out_shape=jax.ShapeDtypeStruct((B, rows, lanes), out_dtype),
            grid_spec=pltpu.PrefetchScalarGridSpec(
                num_scalar_prefetch=0,
                grid=grid,
                in_specs=[
                    # Lane/sublane-dense batch tile per grid step.
                    pl.BlockSpec((TB, rows, lanes), lambda b: (b, 0, 0)),
                    # Same pe block every step; single-buffered when supported.
                    pe_spec,
                ],
                out_specs=pl.BlockSpec((TB, rows, lanes), lambda b: (b, 0, 0)),
            ),
            compiler_params=pltpu.CompilerParams(
                dimension_semantics=("parallel",),
                vmem_limit_bytes=vmem_bytes,
            ),
            # Write result into x's buffer (only a win when caller donates x under jit).
            input_output_aliases=({0: 0} if in_place else {}),
        )(x3d, pe3d)

    pe_mode = pl.Buffered(1) if hasattr(pl, "Buffered") else None
    try:
        out3d = call(pe_mode)
    except Exception:
        if pe_mode is None:
            raise
        out3d = call(None)  # fall back to default double-buffered pe

    return out3d.reshape(B, S, D)


if __name__ == "__main__":
    key = jax.random.PRNGKey(0)
    kx, kp = jax.random.split(key)

    B = 2
    # PyTorch init is zeros; use deterministic random values so the add is
    # non-trivial to verify.
    x = jax.random.normal(kx, (B, SEQ, DIM), dtype=jnp.float32)
    position_embeddings = jax.random.normal(kp, (1, SEQ, DIM), dtype=jnp.float32)

    out = learned_positional_encoding(x, position_embeddings)
    out = jax.block_until_ready(out)

    # Reference check (pure JAX broadcast add, same as PyTorch semantics).
    ref = x + position_embeddings
    assert out.shape == (B, SEQ, DIM)
    assert out.dtype == x.dtype
    assert jnp.allclose(out, ref, atol=1e-6, rtol=1e-6)

    print("KERNEL_OK")
</pallas_src>

<mosaic_0001>
module attributes {stable_mosaic.version = 11 : i64} {
  func.func @_add_pos_kernel(%arg0: i32, %arg1: memref<2x690x128xf32, #tpu.memory_space<vmem>>, %arg2: memref<1x690x128xf32, #tpu.memory_space<vmem>>, %arg3: memref<2x690x128xf32, #tpu.memory_space<vmem>>) attributes {dimension_semantics = [#tpu.dimension_semantics<parallel>], iteration_bounds = array<i64: 1>, scalar_prefetch = 0 : i64, scratch_operands = 0 : i64, tpu.core_type = #tpu.core_type<tc>, window_params = [{transform_indices = @transform_0, window_bounds = array<i64: 2, 690, 128>}, {pipeline_mode = #tpu.pipeline_mode<synchronous>, transform_indices = @transform_1, window_bounds = array<i64: 1, 690, 128>}, {transform_indices = @transform_2, window_bounds = array<i64: 2, 690, 128>}]} {
    %c0 = arith.constant 0 : index
    %c0_0 = arith.constant 0 : index
    %c0_1 = arith.constant 0 : index
    %0 = vector.load %arg1[%c0, %c0_0, %c0_1] : memref<2x690x128xf32, #tpu.memory_space<vmem>>, vector<2x690x128xf32>
    %c0_2 = arith.constant 0 : index
    %c0_3 = arith.constant 0 : index
    %c0_4 = arith.constant 0 : index
    %1 = vector.load %arg2[%c0_2, %c0_3, %c0_4] : memref<1x690x128xf32, #tpu.memory_space<vmem>>, vector<1x690x128xf32>
    %2 = vector.broadcast %1 : vector<1x690x128xf32> to vector<2x690x128xf32>
    %3 = arith.addf %0, %2 : vector<2x690x128xf32>
    %c0_5 = arith.constant 0 : index
    %c0_6 = arith.constant 0 : index
    %c0_7 = arith.constant 0 : index
    %4 = vector.load %arg3[%c0_5, %c0_6, %c0_7] : memref<2x690x128xf32, #tpu.memory_space<vmem>>, vector<2x690x128xf32>
    tpu.vector_store %arg3[%c0_5, %c0_6, %c0_7], %3 {strides = array<i32>} : memref<2x690x128xf32, #tpu.memory_space<vmem>>, vector<2x690x128xf32>,
    return
  }
  func.func @transform_0(%arg0: i32) -> (i32, i32, i32) {
    %c0_i32 = arith.constant 0 : i32
    %c0_i32_0 = arith.constant 0 : i32
    %c0_i32_1 = arith.constant 0 : i32
    return %arg0, %c0_i32, %c0_i32_0 : i32, i32, i32
  }
  func.func @transform_1(%arg0: i32) -> (i32, i32, i32) {
    %c0_i32 = arith.constant 0 : i32
    %c0_i32_0 = arith.constant 0 : i32
    %c0_i32_1 = arith.constant 0 : i32
    %c0_i32_2 = arith.constant 0 : i32
    return %c0_i32, %c0_i32_0, %c0_i32_1 : i32, i32, i32
  }
  func.func @transform_2(%arg0: i32) -> (i32, i32, i32) {
    %c0_i32 = arith.constant 0 : i32
    %c0_i32_0 = arith.constant 0 : i32
    %c0_i32_1 = arith.constant 0 : i32
    return %arg0, %c0_i32, %c0_i32_0 : i32, i32, i32
  }
}

module attributes {stable_mosaic.version = 11 : i64} {
  func.func @_add_pos_kernel(%arg0: i32, %arg1: memref<2x690x128xf32, #tpu.memory_space<vmem>>, %arg2: memref<1x690x128xf32, #tpu.memory_space<vmem>>, %arg3: memref<2x690x128xf32, #tpu.memory_space<vmem>>) attributes {dimension_semantics = [#tpu.dimension_semantics<parallel>], iteration_bounds = array<i64: 1>, scalar_prefetch = 0 : i64, scratch_operands = 0 : i64, tpu.core_type = #tpu.core_type<tc>, window_params = [{transform_indices = @transform_0, window_bounds = array<i64: 2, 690, 128>}, {pipeline_mode = #tpu.pipeline_mode<synchronous>, transform_indices = @transform_1, window_bounds = array<i64: 1, 690, 128>}, {transform_indices = @transform_2, window_bounds = array<i64: 2, 690, 128>}]} {
    %c0 = arith.constant 0 : index
    %c0_0 = arith.constant 0 : index
    %c0_1 = arith.constant 0 : index
    %0 = vector.load %arg1[%c0, %c0_0, %c0_1] : memref<2x690x128xf32, #tpu.memory_space<vmem>>, vector<2x690x128xf32>
    %c0_2 = arith.constant 0 : index
    %c0_3 = arith.constant 0 : index
    %c0_4 = arith.constant 0 : index
    %1 = vector.load %arg2[%c0_2, %c0_3, %c0_4] : memref<1x690x128xf32, #tpu.memory_space<vmem>>, vector<1x690x128xf32>
    %2 = vector.broadcast %1 : vector<1x690x128xf32> to vector<2x690x128xf32>
    %3 = arith.addf %0, %2 : vector<2x690x128xf32>
    %c0_5 = arith.constant 0 : index
    %c0_6 = arith.constant 0 : index
    %c0_7 = arith.constant 0 : index
    %4 = vector.load %arg3[%c0_5, %c0_6, %c0_7] : memref<2x690x128xf32, #tpu.memory_space<vmem>>, vector<2x690x128xf32>
    tpu.vector_store %arg3[%c0_5, %c0_6, %c0_7], %3 {strides = array<i32>} : memref<2x690x128xf32, #tpu.memory_space<vmem>>, vector<2x690x128xf32>,
    return
  }
  func.func @transform_0(%arg0: i32) -> (i32, i32, i32) {
    %c0_i32 = arith.constant 0 : i32
    %c0_i32_0 = arith.constant 0 : i32
    %c0_i32_1 = arith.constant 0 : i32
    return %arg0, %c0_i32, %c0_i32_0 : i32, i32, i32
  }
  func.func @transform_1(%arg0: i32) -> (i32, i32, i32) {
    %c0_i32 = arith.constant 0 : i32
    %c0_i32_0 = arith.constant 0 : i32
    %c0_i32_1 = arith.constant 0 : i32
    %c0_i32_2 = arith.constant 0 : i32
    return %c0_i32, %c0_i32_0, %c0_i32_1 : i32, i32, i32
  }
  func.func @transform_2(%arg0: i32) -> (i32, i32, i32) {
    %c0_i32 = arith.constant 0 : i32
    %c0_i32_0 = arith.constant 0 : i32
    %c0_i32_1 = arith.constant 0 : i32
    return %arg0, %c0_i32, %c0_i32_0 : i32, i32, i32
  }
}

</mosaic_0001>

<bundles_post_ra>
// kernel: tpu_custom_call.1
= control target key start
LH: loop header
LB: loop body
LE: loop exit
PB: predicated region body
PF: predicated region fallthrough
CT: control target
= control target key end

     0   :  { %s2292_s0 = inlined_call_operand.vmem [shape: f32[2,690,128], index: 0, kind: input, shape index: {}]   ;;  %s2293_s1 = inlined_call_operand.vmem [shape: f32[1,690,128], index: 1, kind: input, shape index: {}]   ;;  %s2294_s2 = inlined_call_operand.vmem [shape: f32[2,690,128], index: 2, kind: output, shape index: {}]  }
   0x1   :  { %v11_v0 = vld [vmem:[%s2292_s0] sm:$0xff]  ;;  %v12_v2 = vld [vmem:[%s2292_s0 + $0x8] sm:$0xff]  ;;  %v13_v5 = vld [vmem:[%s2292_s0 + $0x10] sm:$0xff] }
   0x2   :  { %v645_v1 = vld [vmem:[%s2293_s1] sm:$0xff]  ;;  %v654_v4 = vld [vmem:[%s2293_s1 + $0x8] sm:$0xff]  ;;  %v662_v6 = vld [vmem:[%s2293_s1 + $0x10] sm:$0xff] }
   0x3   :  { %v272_v3 = vadd.f32 %v645_v1, %v11_v0  ;;  %v273_v7 = vadd.f32 %v654_v4, %v12_v2  ;;  %v274_v8 = vadd.f32 %v662_v6, %v13_v5  ;;  %v14_v9 = vld [vmem:[%s2292_s0 + $0x18] sm:$0xff]  ;;  %v15_v11 = vld [vmem:[%s2292_s0 + $0x20] sm:$0xff]  ;;  %v16_v14 = vld [vmem:[%s2292_s0 + $0x28] sm:$0xff] }
   0x4   :  { %v672_v10 = vld [vmem:[%s2293_s1 + $0x18] sm:$0xff]  ;;  %v684_v13 = vld [vmem:[%s2293_s1 + $0x20] sm:$0xff]  ;;  %v692_v15 = vld [vmem:[%s2293_s1 + $0x28] sm:$0xff] }
   0x5   :  { %446 = vst [vmem:[%s2294_s2] sm:$0xff] %v272_v3  ;;  %v275_v12 = vadd.f32 %v672_v10, %v14_v9  ;;  %447 = vst [vmem:[%s2294_s2 + $0x8] sm:$0xff] %v273_v7  ;;  %v276_v16 = vadd.f32 %v684_v13, %v15_v11  ;;  %v277_v17 = vadd.f32 %v692_v15, %v16_v14  ;;  %v17_v18 = vld [vmem:[%s2292_s0 + $0x30] sm:$0xff]  ;;  %v18_v20 = vld [vmem:[%s2292_s0 + $0x38] sm:$0xff] }
   0x6   :  { %448 = vst [vmem:[%s2294_s2 + $0x10] sm:$0xff] %v274_v8  ;;  %v708_v19 = vld [vmem:[%s2293_s1 + $0x30] sm:$0xff]  ;;  %v720_v22 = vld [vmem:[%s2293_s1 + $0x38] sm:$0xff]  ;;  %v19_v23 = vld [vmem:[%s2292_s0 + $0x40] sm:$0xff] }
   0x7   :  { %449 = vst [vmem:[%s2294_s2 + $0x18] sm:$0xff] %v275_v12  ;;  %v278_v21 = vadd.f32 %v708_v19, %v17_v18  ;;  %v728_v24 = vld [vmem:[%s2293_s1 + $0x40] sm:$0xff]  ;;  %450 = vst [vmem:[%s2294_s2 + $0x20] sm:$0xff] %v276_v16  ;;  %v279_v25 = vadd.f32 %v720_v22, %v18_v20  ;;  %v20_v27 = vld [vmem:[%s2292_s0 + $0x48] sm:$0xff] }
   0x8   :  { %451 = vst [vmem:[%s2294_s2 + $0x28] sm:$0xff] %v277_v17  ;;  %v280_v26 = vadd.f32 %v728_v24, %v19_v23  ;;  %v744_v28 = vld [vmem:[%s2293_s1 + $0x48] sm:$0xff]  ;;  %v21_v29 = vld [vmem:[%s2292_s0 + $0x50] sm:$0xff]  ;;  %v22_v32 = vld [vmem:[%s2292_s0 + $0x58] sm:$0xff] }
   0x9   :  { %452 = vst [vmem:[%s2294_s2 + $0x30] sm:$0xff] %v278_v21  ;;  %v281_v30 = vadd.f32 %v744_v28, %v20_v27  ;;  %v756_v31 = vld [vmem:[%s2293_s1 + $0x50] sm:$0xff]  ;;  %v764_v33 = vld [vmem:[%s2293_s1 + $0x58] sm:$0xff]  ;;  %453 = vst [vmem:[%s2294_s2 + $0x38] sm:$0xff] %v279_v25 }
   0xa   :  { %454 = vst [vmem:[%s2294_s2 + $0x40] sm:$0xff] %v280_v26  ;;  %v282_v34 = vadd.f32 %v756_v31, %v21_v29  ;;  %v283_v35 = vadd.f32 %v764_v33, %v22_v32  ;;  %v23_v36 = vld [vmem:[%s2292_s0 + $0x60] sm:$0xff]  ;;  %v24_v38 = vld [vmem:[%s2292_s0 + $0x68] sm:$0xff]  ;;  %v25_v41 = vld [vmem:[%s2292_s0 + $0x70] sm:$0xff] }
   0xb   :  { %v780_v37 = vld [vmem:[%s2293_s1 + $0x60] sm:$0xff]  ;;  %455 = vst [vmem:[%s2294_s2 + $0x48] sm:$0xff] %v281_v30  ;;  %v792_v40 = vld [vmem:[%s2293_s1 + $0x68] sm:$0xff]  ;;  %v800_v42 = vld [vmem:[%s2293_s1 + $0x70] sm:$0xff] }
   0xc   :  { %v284_v39 = vadd.f32 %v780_v37, %v23_v36  ;;  %456 = vst [vmem:[%s2294_s2 + $0x50] sm:$0xff] %v282_v34  ;;  %457 = vst [vmem:[%s2294_s2 + $0x58] sm:$0xff] %v283_v35  ;;  %v285_v43 = vadd.f32 %v792_v40, %v24_v38  ;;  %v286_v44 = vadd.f32 %v800_v42, %v25_v41  ;;  %v26_v45 = vld [vmem:[%s2292_s0 + $0x78] sm:$0xff]  ;;  %v27_v47 = vld [vmem:[%s2292_s0 + $0x80] sm:$0xff] }
   0xd   :  { %v816_v46 = vld [vmem:[%s2293_s1 + $0x78] sm:$0xff]  ;;  %v828_v49 = vld [vmem:[%s2293_s1 + $0x80] sm:$0xff]  ;;  %v28_v50 = vld [vmem:[%s2292_s0 + $0x88] sm:$0xff] }
   0xe   :  { %458 = vst [vmem:[%s2294_s2 + $0x60] sm:$0xff] %v284_v39  ;;  %v287_v48 = vadd.f32 %v816_v46, %v26_v45  ;;  %v836_v51 = vld [vmem:[%s2293_s1 + $0x88] sm:$0xff]  ;;  %459 = vst [vmem:[%s2294_s2 + $0x68] sm:$0xff] %v285_v43  ;;  %v288_v52 = vadd.f32 %v828_v49, %v27_v47  ;;  %v29_v54 = vld [vmem:[%s2292_s0 + $0x90] sm:$0xff] }
   0xf   :  { %460 = vst [vmem:[%s2294_s2 + $0x70] sm:$0xff] %v286_v44  ;;  %v289_v53 = vadd.f32 %v836_v51, %v28_v50  ;;  %v852_v55 = vld [vmem:[%s2293_s1 + $0x90] sm:$0xff]  ;;  %v30_v56 = vld [vmem:[%s2292_s0 + $0x98] sm:$0xff]  ;;  %v31_v59 = vld [vmem:[%s2292_s0 + $0xa0] sm:$0xff] }
  0x10   :  { %461 = vst [vmem:[%s2294_s2 + $0x78] sm:$0xff] %v287_v48  ;;  %v290_v57 = vadd.f32 %v852_v55, %v29_v54  ;;  %v864_v58 = vld [vmem:[%s2293_s1 + $0x98] sm:$0xff]  ;;  %v872_v60 = vld [vmem:[%s2293_s1 + $0xa0] sm:$0xff]  ;;  %462 = vst [vmem:[%s2294_s2 + $0x80] sm:$0xff] %v288_v52 }
  0x11   :  { %463 = vst [vmem:[%s2294_s2 + $0x88] sm:$0xff] %v289_v53  ;;  %v291_v61 = vadd.f32 %v864_v58, %v30_v56  ;;  %v292_v62 = vadd.f32 %v872_v60, %v31_v59  ;;  %v32_v63 = vld [vmem:[%s2292_s0 + $0xa8] sm:$0xff]  ;;  %v33_v2 = vld [vmem:[%s2292_s0 + $0xb0] sm:$0xff]  ;;  %v34_v7 = vld [vmem:[%s2292_s0 + $0xb8] sm:$0xff] }
  0x12   :  { %v888_v0 = vld [vmem:[%s2293_s1 + $0xa8] sm:$0xff]  ;;  %464 = vst [vmem:[%s2294_s2 + $0x90] sm:$0xff] %v290_v57  ;;  %v900_v5 = vld [vmem:[%s2293_s1 + $0xb0] sm:$0xff]  ;;  %v908_v8 = vld [vmem:[%s2293_s1 + $0xb8] sm:$0xff] }
  0x13   :  { %v293_v3 = vadd.f32 %v888_v0, %v32_v63  ;;  %465 = vst [vmem:[%s2294_s2 + $0x98] sm:$0xff] %v291_v61  ;;  %466 = vst [vmem:[%s2294_s2 + $0xa0] sm:$0xff] %v292_v62  ;;  %v294_v9 = vadd.f32 %v900_v5, %v33_v2  ;;  %v295_v11 = vadd.f32 %v908_v8, %v34_v7  ;;  %v35_v12 = vld [vmem:[%s2292_s0 + $0xc0] sm:$0xff]  ;;  %v36_v16 = vld [vmem:[%s2292_s0 + $0xc8] sm:$0xff] }
  0x14   :  { %v924_v14 = vld [vmem:[%s2293_s1 + $0xc0] sm:$0xff]  ;;  %v936_v18 = vld [vmem:[%s2293_s1 + $0xc8] sm:$0xff]  ;;  %v37_v20 = vld [vmem:[%s2292_s0 + $0xd0] sm:$0xff] }
  0x15   :  { %467 = vst [vmem:[%s2294_s2 + $0xa8] sm:$0xff] %v293_v3  ;;  %v296_v17 = vadd.f32 %v924_v14, %v35_v12  ;;  %v944_v21 = vld [vmem:[%s2293_s1 + $0xd0] sm:$0xff]  ;;  %468 = vst [vmem:[%s2294_s2 + $0xb0] sm:$0xff] %v294_v9  ;;  %v297_v23 = vadd.f32 %v936_v18, %v36_v16  ;;  %v38_v26 = vld [vmem:[%s2292_s0 + $0xd8] sm:$0xff] }
  0x16   :  { %469 = vst [vmem:[%s2294_s2 + $0xb8] sm:$0xff] %v295_v11  ;;  %v298_v25 = vadd.f32 %v944_v21, %v37_v20  ;;  %v960_v27 = vld [vmem:[%s2293_s1 + $0xd8] sm:$0xff]  ;;  %v39_v29 = vld [vmem:[%s2292_s0 + $0xe0] sm:$0xff]  ;;  %v40_v34 = vld [vmem:[%s2292_s0 + $0xe8] sm:$0xff] }
  0x17   :  { %470 = vst [vmem:[%s2294_s2 + $0xc0] sm:$0xff] %v296_v17  ;;  %v299_v30 = vadd.f32 %v960_v27, %v38_v26  ;;  %v972_v32 = vld [vmem:[%s2293_s1 + $0xe0] sm:$0xff]  ;;  %v980_v35 = vld [vmem:[%s2293_s1 + $0xe8] sm:$0xff]  ;;  %471 = vst [vmem:[%s2294_s2 + $0xc8] sm:$0xff] %v297_v23 }
  0x18   :  { %472 = vst [vmem:[%s2294_s2 + $0xd0] sm:$0xff] %v298_v25  ;;  %v300_v36 = vadd.f32 %v972_v32, %v39_v29  ;;  %v301_v38 = vadd.f32 %v980_v35, %v40_v34  ;;  %v41_v39 = vld [vmem:[%s2292_s0 + $0xf0] sm:$0xff]  ;;  %v42_v43 = vld [vmem:[%s2292_s0 + $0xf8] sm:$0xff]  ;;  %v43_v47 = vld [vmem:[%s2292_s0 + $0x100] sm:$0xff] }
  0x19   :  { %v996_v41 = vld [vmem:[%s2293_s1 + $0xf0] sm:$0xff]  ;;  %473 = vst [vmem:[%s2294_s2 + $0xd8] sm:$0xff] %v299_v30  ;;  %v1008_v45 = vld [vmem:[%s2293_s1 + $0xf8] sm:$0xff]  ;;  %v1016_v48 = vld [vmem:[%s2293_s1 + $0x100] sm:$0xff] }
  0x1a   :  { %v302_v44 = vadd.f32 %v996_v41, %v41_v39  ;;  %474 = vst [vmem:[%s2294_s2 + $0xe0] sm:$0xff] %v300_v36  ;;  %475 = vst [vmem:[%s2294_s2 + $0xe8] sm:$0xff] %v301_v38  ;;  %v303_v50 = vadd.f32 %v1008_v45, %v42_v43  ;;  %v304_v52 = vadd.f32 %v1016_v48, %v43_v47  ;;  %v44_v53 = vld [vmem:[%s2292_s0 + $0x108] sm:$0xff]  ;;  %v45_v56 = vld [vmem:[%s2292_s0 + $0x110] sm:$0xff] }
  0x1b   :  { %v1032_v54 = vld [vmem:[%s2293_s1 + $0x108] sm:$0xff]  ;;  %v1044_v59 = vld [vmem:[%s2293_s1 + $0x110] sm:$0xff]  ;;  %v46_v61 = vld [vmem:[%s2292_s0 + $0x118] sm:$0xff] }
  0x1c   :  { %476 = vst [vmem:[%s2294_s2 + $0xf0] sm:$0xff] %v302_v44  ;;  %v305_v57 = vadd.f32 %v1032_v54, %v44_v53  ;;  %v1052_v62 = vld [vmem:[%s2293_s1 + $0x118] sm:$0xff]  ;;  %477 = vst [vmem:[%s2294_s2 + $0xf8] sm:$0xff] %v303_v50  ;;  %v306_v63 = vadd.f32 %v1044_v59, %v45_v56  ;;  %v47_v3 = vld [vmem:[%s2292_s0 + $0x120] sm:$0xff] }
  0x1d   :  { %478 = vst [vmem:[%s2294_s2 + $0x100] sm:$0xff] %v304_v52  ;;  %v307_v2 = vadd.f32 %v1052_v62, %v46_v61  ;;  %v1068_v7 = vld [vmem:[%s2293_s1 + $0x120] sm:$0xff]  ;;  %v48_v9 = vld [vmem:[%s2292_s0 + $0x128] sm:$0xff]  ;;  %v49_v16 = vld [vmem:[%s2292_s0 + $0x130] sm:$0xff] }
  0x1e   :  { %479 = vst [vmem:[%s2294_s2 + $0x108] sm:$0xff] %v305_v57  ;;  %v308_v11 = vadd.f32 %v1068_v7, %v47_v3  ;;  %v1080_v12 = vld [vmem:[%s2293_s1 + $0x128] sm:$0xff]  ;;  %v1088_v17 = vld [vmem:[%s2293_s1 + $0x130] sm:$0xff]  ;;  %480 = vst [vmem:[%s2294_s2 + $0x110] sm:$0xff] %v306_v63 }
  0x1f   :  { %481 = vst [vmem:[%s2294_s2 + $0x118] sm:$0xff] %v307_v2  ;;  %v309_v20 = vadd.f32 %v1080_v12, %v48_v9  ;;  %v310_v23 = vadd.f32 %v1088_v17, %v49_v16  ;;  %v50_v25 = vld [vmem:[%s2292_s0 + $0x138] sm:$0xff]  ;;  %v51_v29 = vld [vmem:[%s2292_s0 + $0x140] sm:$0xff]  ;;  %v52_v36 = vld [vmem:[%s2292_s0 + $0x148] sm:$0xff] }
  0x20   :  { %v1104_v26 = vld [vmem:[%s2293_s1 + $0x138] sm:$0xff]  ;;  %482 = vst [vmem:[%s2294_s2 + $0x120] sm:$0xff] %v308_v11  ;;  %v1116_v34 = vld [vmem:[%s2293_s1 + $0x140] sm:$0xff]  ;;  %v1124_v38 = vld [vmem:[%s2293_s1 + $0x148] sm:$0xff] }
  0x21   :  { %v311_v30 = vadd.f32 %v1104_v26, %v50_v25  ;;  %483 = vst [vmem:[%s2294_s2 + $0x128] sm:$0xff] %v309_v20  ;;  %484 = vst [vmem:[%s2294_s2 + $0x130] sm:$0xff] %v310_v23  ;;  %v312_v39 = vadd.f32 %v1116_v34, %v51_v29  ;;  %v313_v43 = vadd.f32 %v1124_v38, %v52_v36  ;;  %v53_v44 = vld [vmem:[%s2292_s0 + $0x150] sm:$0xff]  ;;  %v54_v50 = vld [vmem:[%s2292_s0 + $0x158] sm:$0xff] }
  0x22   :  { %v1140_v47 = vld [vmem:[%s2293_s1 + $0x150] sm:$0xff]  ;;  %v1152_v53 = vld [vmem:[%s2293_s1 + $0x158] sm:$0xff]  ;;  %v55_v56 = vld [vmem:[%s2292_s0 + $0x160] sm:$0xff] }
  0x23   :  { %485 = vst [vmem:[%s2294_s2 + $0x138] sm:$0xff] %v311_v30  ;;  %v314_v52 = vadd.f32 %v1140_v47, %v53_v44  ;;  %v1160_v57 = vld [vmem:[%s2293_s1 + $0x160] sm:$0xff]  ;;  %486 = vst [vmem:[%s2294_s2 + $0x140] sm:$0xff] %v312_v39  ;;  %v315_v61 = vadd.f32 %v1152_v53, %v54_v50  ;;  %v56_v2 = vld [vmem:[%s2292_s0 + $0x168] sm:$0xff] }
  0x24   :  { %487 = vst [vmem:[%s2294_s2 + $0x148] sm:$0xff] %v313_v43  ;;  %v316_v63 = vadd.f32 %v1160_v57, %v55_v56  ;;  %v1176_v3 = vld [vmem:[%s2293_s1 + $0x168] sm:$0xff]  ;;  %v57_v9 = vld [vmem:[%s2292_s0 + $0x170] sm:$0xff]  ;;  %v58_v20 = vld [vmem:[%s2292_s0 + $0x178] sm:$0xff] }
  0x25   :  { %488 = vst [vmem:[%s2294_s2 + $0x150] sm:$0xff] %v314_v52  ;;  %v317_v11 = vadd.f32 %v1176_v3, %v56_v2  ;;  %v1188_v16 = vld [vmem:[%s2293_s1 + $0x170] sm:$0xff]  ;;  %v1196_v23 = vld [vmem:[%s2293_s1 + $0x178] sm:$0xff]  ;;  %489 = vst [vmem:[%s2294_s2 + $0x158] sm:$0xff] %v315_v61 }
  0x26   :  { %490 = vst [vmem:[%s2294_s2 + $0x160] sm:$0xff] %v316_v63  ;;  %v318_v25 = vadd.f32 %v1188_v16, %v57_v9  ;;  %v319_v29 = vadd.f32 %v1196_v23, %v58_v20  ;;  %v59_v30 = vld [vmem:[%s2292_s0 + $0x180] sm:$0xff]  ;;  %v60_v39 = vld [vmem:[%s2292_s0 + $0x188] sm:$0xff]  ;;  %v61_v50 = vld [vmem:[%s2292_s0 + $0x190] sm:$0xff] }
  0x27   :  { %v1212_v36 = vld [vmem:[%s2293_s1 + $0x180] sm:$0xff]  ;;  %491 = vst [vmem:[%s2294_s2 + $0x168] sm:$0xff] %v317_v11  ;;  %v1224_v44 = vld [vmem:[%s2293_s1 + $0x188] sm:$0xff]  ;;  %v1232_v52 = vld [vmem:[%s2293_s1 + $0x190] sm:$0xff] }
  0x28   :  { %v320_v43 = vadd.f32 %v1212_v36, %v59_v30  ;;  %492 = vst [vmem:[%s2294_s2 + $0x170] sm:$0xff] %v318_v25  ;;  %493 = vst [vmem:[%s2294_s2 + $0x178] sm:$0xff] %v319_v29  ;;  %v321_v56 = vadd.f32 %v1224_v44, %v60_v39  ;;  %v322_v61 = vadd.f32 %v1232_v52, %v61_v50  ;;  %v62_v63 = vld [vmem:[%s2292_s0 + $0x198] sm:$0xff]  ;;  %v63_v9 = vld [vmem:[%s2292_s0 + $0x1a0] sm:$0xff] }
  0x29   :  { %v1248_v2 = vld [vmem:[%s2293_s1 + $0x198] sm:$0xff]  ;;  %v1260_v20 = vld [vmem:[%s2293_s1 + $0x1a0] sm:$0xff]  ;;  %v64_v25 = vld [vmem:[%s2292_s0 + $0x1a8] sm:$0xff] }
  0x2a   :  { %494 = vst [vmem:[%s2294_s2 + $0x180] sm:$0xff] %v320_v43  ;;  %v323_v11 = vadd.f32 %v1248_v2, %v62_v63  ;;  %2330 = vst [vmem:[#allocation2_spill] sm:$0xff] %v1260_v20  ;;  %v1268_v29 = vld [vmem:[%s2293_s1 + $0x1a8] sm:$0xff]  ;;  %v324_v30 = vadd.f32 %v1260_v20, %v63_v9  ;;  %v65_v43 = vld [vmem:[%s2292_s0 + $0x1b0] sm:$0xff] }
  0x2b   :  { %2331 = vst [vmem:[#allocation3_spill] sm:$0xff] %v1268_v29  ;;  %495 = vst [vmem:[%s2294_s2 + $0x188] sm:$0xff] %v321_v56  ;;  %v325_v39 = vadd.f32 %v1268_v29, %v64_v25  ;;  %v1284_v50 = vld [vmem:[%s2293_s1 + $0x1b0] sm:$0xff]  ;;  %v66_v56 = vld [vmem:[%s2292_s0 + $0x1b8] sm:$0xff] }
  0x2c   :  { %496 = vst [vmem:[%s2294_s2 + $0x190] sm:$0xff] %v322_v61  ;;  %2332 = vst [vmem:[#allocation4_spill] sm:$0xff] %v1284_v50  ;;  %v326_v61 = vadd.f32 %v1284_v50, %v65_v43  ;;  %v1296_v63 = vld [vmem:[%s2293_s1 + $0x1b8] sm:$0xff]  ;;  %v67_v9 = vld [vmem:[%s2292_s0 + $0x1c0] sm:$0xff] }
  0x2d   :  { %497 = vst [vmem:[%s2294_s2 + $0x198] sm:$0xff] %v323_v11  ;;  %2333 = vst [vmem:[#allocation5_spill] sm:$0xff] %v1296_v63  ;;  %v1304_v25 = vld [vmem:[%s2293_s1 + $0x1c0] sm:$0xff]  ;;  %v327_v11 = vadd.f32 %v1296_v63, %v66_v56  ;;  %v68_v50 = vld [vmem:[%s2292_s0 + $0x1c8] sm:$0xff] }
  0x2e   :  { %2334 = vst [vmem:[#allocation6_spill] sm:$0xff] %v1304_v25  ;;  %498 = vst [vmem:[%s2294_s2 + $0x1a0] sm:$0xff] %v324_v30  ;;  %v328_v43 = vadd.f32 %v1304_v25, %v67_v9  ;;  %v1320_v29 = vld [vmem:[%s2293_s1 + $0x1c8] sm:$0xff]  ;;  %v69_v30 = vld [vmem:[%s2292_s0 + $0x1d0] sm:$0xff] }
  0x2f   :  { %499 = vst [vmem:[%s2294_s2 + $0x1a8] sm:$0xff] %v325_v39  ;;  %2335 = vst [vmem:[#allocation7_spill] sm:$0xff] %v1320_v29  ;;  %v329_v39 = vadd.f32 %v1320_v29, %v68_v50  ;;  %v1332_v56 = vld [vmem:[%s2293_s1 + $0x1d0] sm:$0xff]  ;;  %v70_v9 = vld [vmem:[%s2292_s0 + $0x1d8] sm:$0xff] }
  0x30   :  { %500 = vst [vmem:[%s2294_s2 + $0x1b0] sm:$0xff] %v326_v61  ;;  %2336 = vst [vmem:[#allocation8_spill] sm:$0xff] %v1332_v56  ;;  %v1340_v25 = vld [vmem:[%s2293_s1 + $0x1d8] sm:$0xff]  ;;  %v330_v50 = vadd.f32 %v1332_v56, %v69_v30  ;;  %v71_v29 = vld [vmem:[%s2292_s0 + $0x1e0] sm:$0xff] }
  0x31   :  { %2337 = vst [vmem:[#allocation9_spill] sm:$0xff] %v1340_v25  ;;  %501 = vst [vmem:[%s2294_s2 + $0x1b8] sm:$0xff] %v327_v11  ;;  %v331_v61 = vadd.f32 %v1340_v25, %v70_v9  ;;  %v1356_v63 = vld [vmem:[%s2293_s1 + $0x1e0] sm:$0xff]  ;;  %v72_v11 = vld [vmem:[%s2292_s0 + $0x1e8] sm:$0xff] }
  0x32   :  { %502 = vst [vmem:[%s2294_s2 + $0x1c0] sm:$0xff] %v328_v43  ;;  %2338 = vst [vmem:[#allocation10_spill] sm:$0xff] %v1356_v63  ;;  %v332_v43 = vadd.f32 %v1356_v63, %v71_v29  ;;  %v1368_v30 = vld [vmem:[%s2293_s1 + $0x1e8] sm:$0xff]  ;;  %v73_v9 = vld [vmem:[%s2292_s0 + $0x1f0] sm:$0xff] }
  0x33   :  { %503 = vst [vmem:[%s2294_s2 + $0x1c8] sm:$0xff] %v329_v39  ;;  %2339 = vst [vmem:[#allocation11_spill] sm:$0xff] %v1368_v30  ;;  %v1376_v25 = vld [vmem:[%s2293_s1 + $0x1f0] sm:$0xff]  ;;  %v333_v29 = vadd.f32 %v1368_v30, %v72_v11  ;;  %v74_v63 = vld [vmem:[%s2292_s0 + $0x1f8] sm:$0xff] }
  0x34   :  { %2340 = vst [vmem:[#allocation12_spill] sm:$0xff] %v1376_v25  ;;  %504 = vst [vmem:[%s2294_s2 + $0x1d0] sm:$0xff] %v330_v50  ;;  %v334_v39 = vadd.f32 %v1376_v25, %v73_v9  ;;  %v1392_v56 = vld [vmem:[%s2293_s1 + $0x1f8] sm:$0xff]  ;;  %v75_v50 = vld [vmem:[%s2292_s0 + $0x200] sm:$0xff] }
  0x35   :  { %505 = vst [vmem:[%s2294_s2 + $0x1d8] sm:$0xff] %v331_v61  ;;  %2341 = vst [vmem:[#allocation13_spill] sm:$0xff] %v1392_v56  ;;  %v335_v61 = vadd.f32 %v1392_v56, %v74_v63  ;;  %v1404_v11 = vld [vmem:[%s2293_s1 + $0x200] sm:$0xff]  ;;  %v76_v9 = vld [vmem:[%s2292_s0 + $0x208] sm:$0xff] }
  0x36   :  { %506 = vst [vmem:[%s2294_s2 + $0x1e0] sm:$0xff] %v332_v43  ;;  %2342 = vst [vmem:[#allocation14_spill] sm:$0xff] %v1404_v11  ;;  %v1412_v25 = vld [vmem:[%s2293_s1 + $0x208] sm:$0xff]  ;;  %v336_v63 = vadd.f32 %v1404_v11, %v75_v50  ;;  %v77_v56 = vld [vmem:[%s2292_s0 + $0x210] sm:$0xff] }
  0x37   :  { %2343 = vst [vmem:[#allocation15_spill] sm:$0xff] %v1412_v25  ;;  %507 = vst [vmem:[%s2294_s2 + $0x1e8] sm:$0xff] %v333_v29  ;;  %v337_v43 = vadd.f32 %v1412_v25, %v76_v9  ;;  %v1428_v30 = vld [vmem:[%s2293_s1 + $0x210] sm:$0xff]  ;;  %v78_v29 = vld [vmem:[%s2292_s0 + $0x218] sm:$0xff] }
  0x38   :  { %508 = vst [vmem:[%s2294_s2 + $0x1f0] sm:$0xff] %v334_v39  ;;  %2344 = vst [vmem:[#allocation16_spill] sm:$0xff] %v1428_v30  ;;  %v338_v39 = vadd.f32 %v1428_v30, %v77_v56  ;;  %v1440_v50 = vld [vmem:[%s2293_s1 + $0x218] sm:$0xff]  ;;  %v79_v9 = vld [vmem:[%s2292_s0 + $0x220] sm:$0xff] }
  0x39   :  { %509 = vst [vmem:[%s2294_s2 + $0x1f8] sm:$0xff] %v335_v61  ;;  %2345 = vst [vmem:[#allocation17_spill] sm:$0xff] %v1440_v50  ;;  %v1448_v25 = vld [vmem:[%s2293_s1 + $0x220] sm:$0xff]  ;;  %v339_v56 = vadd.f32 %v1440_v50, %v78_v29  ;;  %v80_v30 = vld [vmem:[%s2292_s0 + $0x228] sm:$0xff] }
  0x3a   :  { %2346 = vst [vmem:[#allocation18_spill] sm:$0xff] %v1448_v25  ;;  %510 = vst [vmem:[%s2294_s2 + $0x200] sm:$0xff] %v336_v63  ;;  %v340_v61 = vadd.f32 %v1448_v25, %v79_v9  ;;  %v1464_v11 = vld [vmem:[%s2293_s1 + $0x228] sm:$0xff]  ;;  %v81_v63 = vld [vmem:[%s2292_s0 + $0x230] sm:$0xff] }
  0x3b   :  { %511 = vst [vmem:[%s2294_s2 + $0x208] sm:$0xff] %v337_v43  ;;  %2347 = vst [vmem:[#allocation19_spill] sm:$0xff] %v1464_v11  ;;  %v341_v43 = vadd.f32 %v1464_v11, %v80_v30  ;;  %v1476_v29 = vld [vmem:[%s2293_s1 + $0x230] sm:$0xff]  ;;  %v82_v9 = vld [vmem:[%s2292_s0 + $0x238] sm:$0xff] }
  0x3c   :  { %512 = vst [vmem:[%s2294_s2 + $0x210] sm:$0xff] %v338_v39  ;;  %2348 = vst [vmem:[#allocation20_spill] sm:$0xff] %v1476_v29  ;;  %v1484_v25 = vld [vmem:[%s2293_s1 + $0x238] sm:$0xff]  ;;  %v342_v30 = vadd.f32 %v1476_v29, %v81_v63  ;;  %v83_v11 = vld [vmem:[%s2292_s0 + $0x240] sm:$0xff] }
  0x3d   :  { %2349 = vst [vmem:[#allocation21_spill] sm:$0xff] %v1484_v25  ;;  %513 = vst [vmem:[%s2294_s2 + $0x218] sm:$0xff] %v339_v56  ;;  %v343_v39 = vadd.f32 %v1484_v25, %v82_v9  ;;  %v1500_v50 = vld [vmem:[%s2293_s1 + $0x240] sm:$0xff]  ;;  %v84_v56 = vld [vmem:[%s2292_s0 + $0x248] sm:$0xff] }
  0x3e   :  { %514 = vst [vmem:[%s2294_s2 + $0x220] sm:$0xff] %v340_v61  ;;  %2350 = vst [vmem:[#allocation22_spill] sm:$0xff] %v1500_v50  ;;  %v344_v61 = vadd.f32 %v1500_v50, %v83_v11  ;;  %v1512_v63 = vld [vmem:[%s2293_s1 + $0x248] sm:$0xff]  ;;  %v85_v9 = vld [vmem:[%s2292_s0 + $0x250] sm:$0xff] }
  0x3f   :  { %515 = vst [vmem:[%s2294_s2 + $0x228] sm:$0xff] %v341_v43  ;;  %2351 = vst [vmem:[#allocation23_spill] sm:$0xff] %v1512_v63  ;;  %v1520_v25 = vld [vmem:[%s2293_s1 + $0x250] sm:$0xff]  ;;  %v345_v11 = vadd.f32 %v1512_v63, %v84_v56  ;;  %v86_v50 = vld [vmem:[%s2292_s0 + $0x258] sm:$0xff] }
  0x40   :  { %2352 = vst [vmem:[#allocation24_spill] sm:$0xff] %v1520_v25  ;;  %516 = vst [vmem:[%s2294_s2 + $0x230] sm:$0xff] %v342_v30  ;;  %v346_v43 = vadd.f32 %v1520_v25, %v85_v9  ;;  %v1536_v29 = vld [vmem:[%s2293_s1 + $0x258] sm:$0xff]  ;;  %v87_v30 = vld [vmem:[%s2292_s0 + $0x260] sm:$0xff] }
  0x41   :  { %517 = vst [vmem:[%s2294_s2 + $0x238] sm:$0xff] %v343_v39  ;;  %2353 = vst [vmem:[#allocation25_spill] sm:$0xff] %v1536_v29  ;;  %v347_v39 = vadd.f32 %v1536_v29, %v86_v50  ;;  %v1548_v56 = vld [vmem:[%s2293_s1 + $0x260] sm:$0xff]  ;;  %v88_v9 = vld [vmem:[%s2292_s0 + $0x268] sm:$0xff] }
  0x42   :  { %518 = vst [vmem:[%s2294_s2 + $0x240] sm:$0xff] %v344_v61  ;;  %2354 = vst [vmem:[#allocation26_spill] sm:$0xff] %v1548_v56  ;;  %v1556_v25 = vld [vmem:[%s2293_s1 + $0x268] sm:$0xff]  ;;  %v348_v50 = vadd.f32 %v1548_v56, %v87_v30  ;;  %v89_v29 = vld [vmem:[%s2292_s0 + $0x270] sm:$0xff] }
  0x43   :  { %2355 = vst [vmem:[#allocation27_spill] sm:$0xff] %v1556_v25  ;;  %519 = vst [vmem:[%s2294_s2 + $0x248] sm:$0xff] %v345_v11  ;;  %v349_v61 = vadd.f32 %v1556_v25, %v88_v9  ;;  %v1572_v63 = vld [vmem:[%s2293_s1 + $0x270] sm:$0xff]  ;;  %v90_v11 = vld [vmem:[%s2292_s0 + $0x278] sm:$0xff] }
  0x44   :  { %520 = vst [vmem:[%s2294_s2 + $0x250] sm:$0xff] %v346_v43  ;;  %2356 = vst [vmem:[#allocation28_spill] sm:$0xff] %v1572_v63  ;;  %v350_v43 = vadd.f32 %v1572_v63, %v89_v29  ;;  %v1584_v30 = vld [vmem:[%s2293_s1 + $0x278] sm:$0xff]  ;;  %v91_v9 = vld [vmem:[%s2292_s0 + $0x280] sm:$0xff] }
  0x45   :  { %521 = vst [vmem:[%s2294_s2 + $0x258] sm:$0xff] %v347_v39  ;;  %2357 = vst [vmem:[#allocation29_spill] sm:$0xff] %v1584_v30  ;;  %v1592_v25 = vld [vmem:[%s2293_s1 + $0x280] sm:$0xff]  ;;  %v351_v29 = vadd.f32 %v1584_v30, %v90_v11  ;;  %v92_v63 = vld [vmem:[%s2292_s0 + $0x288] sm:$0xff] }
  0x46   :  { %2358 = vst [vmem:[#allocation30_spill] sm:$0xff] %v1592_v25  ;;  %522 = vst [vmem:[%s2294_s2 + $0x260] sm:$0xff] %v348_v50  ;;  %v352_v39 = vadd.f32 %v1592_v25, %v91_v9  ;;  %v1608_v56 = vld [vmem:[%s2293_s1 + $0x288] sm:$0xff]  ;;  %v93_v50 = vld [vmem:[%s2292_s0 + $0x290] sm:$0xff] }
  0x47   :  { %523 = vst [vmem:[%s2294_s2 + $0x268] sm:$0xff] %v349_v61  ;;  %2359 = vst [vmem:[#allocation31_spill] sm:$0xff] %v1608_v56  ;;  %v353_v61 = vadd.f32 %v1608_v56, %v92_v63  ;;  %v1620_v11 = vld [vmem:[%s2293_s1 + $0x290] sm:$0xff]  ;;  %v94_v9 = vld [vmem:[%s2292_s0 + $0x298] sm:$0xff] }
  0x48   :  { %524 = vst [vmem:[%s2294_s2 + $0x270] sm:$0xff] %v350_v43  ;;  %2360 = vst [vmem:[#allocation32_spill] sm:$0xff] %v1620_v11  ;;  %v1628_v25 = vld [vmem:[%s2293_s1 + $0x298] sm:$0xff]  ;;  %v354_v63 = vadd.f32 %v1620_v11, %v93_v50  ;;  %v95_v56 = vld [vmem:[%s2292_s0 + $0x2a0] sm:$0xff] }
  0x49   :  { %2361 = vst [vmem:[#allocation33_spill] sm:$0xff] %v1628_v25  ;;  %525 = vst [vmem:[%s2294_s2 + $0x278] sm:$0xff] %v351_v29  ;;  %v355_v43 = vadd.f32 %v1628_v25, %v94_v9  ;;  %v1644_v30 = vld [vmem:[%s2293_s1 + $0x2a0] sm:$0xff]  ;;  %v96_v29 = vld [vmem:[%s2292_s0 + $0x2a8] sm:$0xff] }
  0x4a   :  { %526 = vst [vmem:[%s2294_s2 + $0x280] sm:$0xff] %v352_v39  ;;  %2362 = vst [vmem:[#allocation34_spill] sm:$0xff] %v1644_v30  ;;  %v356_v39 = vadd.f32 %v1644_v30, %v95_v56  ;;  %v1656_v50 = vld [vmem:[%s2293_s1 + $0x2a8] sm:$0xff]  ;;  %v97_v9 = vld [vmem:[%s2292_s0 + $0x2b0] sm:$0x3] }
  0x4b   :  { %527 = vst [vmem:[%s2294_s2 + $0x288] sm:$0xff] %v353_v61  ;;  %2363 = vst [vmem:[#allocation35_spill] sm:$0xff] %v1656_v50  ;;  %v1664_v25 = vld [vmem:[%s2293_s1 + $0x2b0] sm:$0x3]  ;;  %v357_v56 = vadd.f32 %v1656_v50, %v96_v29  ;;  %v98_v30 = vld [vmem:[%s2292_s0 + $0x2b8] sm:$0xff] }
  0x4c   :  { %2364 = vst [vmem:[#allocation36_spill] sm:$0xff] %v1664_v25  ;;  %528 = vst [vmem:[%s2294_s2 + $0x290] sm:$0xff] %v354_v63  ;;  %v358_v61 = vadd.f32 %v1664_v25, %v97_v9  ;;  %v99_v11 = vld [vmem:[%s2292_s0 + $0x2c0] sm:$0xff]  ;;  %v100_v63 = vld [vmem:[%s2292_s0 + $0x2c8] sm:$0xff] }
  0x4d   :  { %529 = vst [vmem:[%s2294_s2 + $0x298] sm:$0xff] %v355_v43  ;;  %530 = vst [vmem:[%s2294_s2 + $0x2a0] sm:$0xff] %v356_v39  ;;  %v359_v43 = vadd.f32 %v645_v1, %v98_v30  ;;  %v360_v29 = vadd.f32 %v654_v4, %v99_v11  ;;  %v361_v9 = vadd.f32 %v662_v6, %v100_v63  ;;  %v101_v25 = vld [vmem:[%s2292_s0 + $0x2d0] sm:$0xff]  ;;  %v102_v50 = vld [vmem:[%s2292_s0 + $0x2d8] sm:$0xff] }
  0x4e   :  { %v103_v20 = vld [vmem:[%s2292_s0 + $0x2e0] sm:$0xff]  ;;  %531 = vst [vmem:[%s2294_s2 + $0x2a8] sm:$0xff] %v357_v56  ;;  %532 = vst [vmem:[%s2294_s2 + $0x2b0] sm:$0x3] %v358_v61  ;;  %v362_v1 = vadd.f32 %v672_v10, %v101_v25  ;;  %v363_v4 = vadd.f32 %v684_v13, %v102_v50  ;;  %v104_v30 = vld [vmem:[%s2292_s0 + $0x2e8] sm:$0xff] }
  0x4f   :  { %v364_v6 = vadd.f32 %v692_v15, %v103_v20  ;;  %v105_v11 = vld [vmem:[%s2292_s0 + $0x2f0] sm:$0xff]  ;;  %v106_v39 = vld [vmem:[%s2292_s0 + $0x2f8] sm:$0xff]  ;;  %533 = vst [vmem:[%s2294_s2 + $0x2b8] sm:$0xff] %v359_v43  ;;  %534 = vst [vmem:[%s2294_s2 + $0x2c0] sm:$0xff] %v360_v29  ;;  %v365_v10 = vadd.f32 %v708_v19, %v104_v30 }
  0x50   :  { %535 = vst [vmem:[%s2294_s2 + $0x2c8] sm:$0xff] %v361_v9  ;;  %v366_v13 = vadd.f32 %v720_v22, %v105_v11  ;;  %v367_v15 = vadd.f32 %v728_v24, %v106_v39  ;;  %v107_v20 = vld [vmem:[%s2292_s0 + $0x300] sm:$0xff]  ;;  %v108_v25 = vld [vmem:[%s2292_s0 + $0x308] sm:$0xff]  ;;  %v109_v50 = vld [vmem:[%s2292_s0 + $0x310] sm:$0xff] }
  0x51   :  { %536 = vst [vmem:[%s2294_s2 + $0x2d0] sm:$0xff] %v362_v1  ;;  %537 = vst [vmem:[%s2294_s2 + $0x2d8] sm:$0xff] %v363_v4  ;;  %v368_v19 = vadd.f32 %v744_v28, %v107_v20  ;;  %v369_v22 = vadd.f32 %v756_v31, %v108_v25  ;;  %v370_v24 = vadd.f32 %v764_v33, %v109_v50  ;;  %v110_v56 = vld [vmem:[%s2292_s0 + $0x318] sm:$0xff]  ;;  %v111_v61 = vld [vmem:[%s2292_s0 + $0x320] sm:$0xff] }
  0x52   :  { %538 = vst [vmem:[%s2294_s2 + $0x2e0] sm:$0xff] %v364_v6  ;;  %v112_v63 = vld [vmem:[%s2292_s0 + $0x328] sm:$0xff]  ;;  %539 = vst [vmem:[%s2294_s2 + $0x2e8] sm:$0xff] %v365_v10  ;;  %v371_v28 = vadd.f32 %v780_v37, %v110_v56  ;;  %v372_v31 = vadd.f32 %v792_v40, %v111_v61  ;;  %v113_v43 = vld [vmem:[%s2292_s0 + $0x330] sm:$0xff] }
  0x53   :  { %540 = vst [vmem:[%s2294_s2 + $0x2f0] sm:$0xff] %v366_v13  ;;  %541 = vst [vmem:[%s2294_s2 + $0x2f8] sm:$0xff] %v367_v15  ;;  %v373_v33 = vadd.f32 %v800_v42, %v112_v63  ;;  %v114_v29 = vld [vmem:[%s2292_s0 + $0x338] sm:$0xff]  ;;  %v115_v9 = vld [vmem:[%s2292_s0 + $0x340] sm:$0xff]  ;;  %v374_v37 = vadd.f32 %v816_v46, %v113_v43 }
  0x54   :  { %542 = vst [vmem:[%s2294_s2 + $0x300] sm:$0xff] %v368_v19  ;;  %543 = vst [vmem:[%s2294_s2 + $0x308] sm:$0xff] %v369_v22  ;;  %v375_v40 = vadd.f32 %v828_v49, %v114_v29  ;;  %v376_v42 = vadd.f32 %v836_v51, %v115_v9  ;;  %v116_v1 = vld [vmem:[%s2292_s0 + $0x348] sm:$0xff]  ;;  %v117_v4 = vld [vmem:[%s2292_s0 + $0x350] sm:$0xff] }
  0x55   :  { %544 = vst [vmem:[%s2294_s2 + $0x310] sm:$0xff] %v370_v24  ;;  %v118_v6 = vld [vmem:[%s2292_s0 + $0x358] sm:$0xff]  ;;  %545 = vst [vmem:[%s2294_s2 + $0x318] sm:$0xff] %v371_v28  ;;  %v377_v46 = vadd.f32 %v852_v55, %v116_v1  ;;  %v378_v49 = vadd.f32 %v864_v58, %v117_v4  ;;  %v119_v30 = vld [vmem:[%s2292_s0 + $0x360] sm:$0xff] }
  0x56   :  { %546 = vst [vmem:[%s2294_s2 + $0x320] sm:$0xff] %v372_v31  ;;  %547 = vst [vmem:[%s2294_s2 + $0x328] sm:$0xff] %v373_v33  ;;  %v379_v51 = vadd.f32 %v872_v60, %v118_v6  ;;  %v120_v11 = vld [vmem:[%s2292_s0 + $0x368] sm:$0xff]  ;;  %v121_v39 = vld [vmem:[%s2292_s0 + $0x370] sm:$0xff]  ;;  %v380_v55 = vadd.f32 %v888_v0, %v119_v30 }
  0x57   :  { %548 = vst [vmem:[%s2294_s2 + $0x330] sm:$0xff] %v374_v37  ;;  %549 = vst [vmem:[%s2294_s2 + $0x338] sm:$0xff] %v375_v40  ;;  %v381_v58 = vadd.f32 %v900_v5, %v120_v11  ;;  %v382_v60 = vadd.f32 %v908_v8, %v121_v39  ;;  %v122_v10 = vld [vmem:[%s2292_s0 + $0x378] sm:$0xff]  ;;  %v123_v13 = vld [vmem:[%s2292_s0 + $0x380] sm:$0xff] }
  0x58   :  { %550 = vst [vmem:[%s2294_s2 + $0x340] sm:$0xff] %v376_v42  ;;  %v124_v15 = vld [vmem:[%s2292_s0 + $0x388] sm:$0xff]  ;;  %551 = vst [vmem:[%s2294_s2 + $0x348] sm:$0xff] %v377_v46  ;;  %v383_v0 = vadd.f32 %v924_v14, %v122_v10  ;;  %v384_v5 = vadd.f32 %v936_v18, %v123_v13  ;;  %v125_v20 = vld [vmem:[%s2292_s0 + $0x390] sm:$0xff] }
  0x59   :  { %552 = vst [vmem:[%s2294_s2 + $0x350] sm:$0xff] %v378_v49  ;;  %553 = vst [vmem:[%s2294_s2 + $0x358] sm:$0xff] %v379_v51  ;;  %v385_v8 = vadd.f32 %v944_v21, %v124_v15  ;;  %v126_v25 = vld [vmem:[%s2292_s0 + $0x398] sm:$0xff]  ;;  %v127_v50 = vld [vmem:[%s2292_s0 + $0x3a0] sm:$0xff]  ;;  %v386_v14 = vadd.f32 %v960_v27, %v125_v20 }
  0x5a   :  { %554 = vst [vmem:[%s2294_s2 + $0x360] sm:$0xff] %v380_v55  ;;  %555 = vst [vmem:[%s2294_s2 + $0x368] sm:$0xff] %v381_v58  ;;  %v387_v18 = vadd.f32 %v972_v32, %v126_v25  ;;  %v388_v21 = vadd.f32 %v980_v35, %v127_v50  ;;  %v128_v19 = vld [vmem:[%s2292_s0 + $0x3a8] sm:$0xff]  ;;  %v129_v22 = vld [vmem:[%s2292_s0 + $0x3b0] sm:$0xff] }
  0x5b   :  { %556 = vst [vmem:[%s2294_s2 + $0x370] sm:$0xff] %v382_v60  ;;  %v130_v24 = vld [vmem:[%s2292_s0 + $0x3b8] sm:$0xff]  ;;  %557 = vst [vmem:[%s2294_s2 + $0x378] sm:$0xff] %v383_v0  ;;  %v389_v27 = vadd.f32 %v996_v41, %v128_v19  ;;  %v390_v32 = vadd.f32 %v1008_v45, %v129_v22  ;;  %v131_v56 = vld [vmem:[%s2292_s0 + $0x3c0] sm:$0xff] }
  0x5c   :  { %558 = vst [vmem:[%s2294_s2 + $0x380] sm:$0xff] %v384_v5  ;;  %559 = vst [vmem:[%s2294_s2 + $0x388] sm:$0xff] %v385_v8  ;;  %v391_v35 = vadd.f32 %v1016_v48, %v130_v24  ;;  %v132_v61 = vld [vmem:[%s2292_s0 + $0x3c8] sm:$0xff]  ;;  %v133_v63 = vld [vmem:[%s2292_s0 + $0x3d0] sm:$0xff]  ;;  %v392_v41 = vadd.f32 %v1032_v54, %v131_v56 }
  0x5d   :  { %560 = vst [vmem:[%s2294_s2 + $0x390] sm:$0xff] %v386_v14  ;;  %561 = vst [vmem:[%s2294_s2 + $0x398] sm:$0xff] %v387_v18  ;;  %v393_v45 = vadd.f32 %v1044_v59, %v132_v61  ;;  %v394_v48 = vadd.f32 %v1052_v62, %v133_v63  ;;  %v134_v28 = vld [vmem:[%s2292_s0 + $0x3d8] sm:$0xff]  ;;  %v135_v31 = vld [vmem:[%s2292_s0 + $0x3e0] sm:$0xff] }
  0x5e   :  { %562 = vst [vmem:[%s2294_s2 + $0x3a0] sm:$0xff] %v388_v21  ;;  %v136_v33 = vld [vmem:[%s2292_s0 + $0x3e8] sm:$0xff]  ;;  %563 = vst [vmem:[%s2294_s2 + $0x3a8] sm:$0xff] %v389_v27  ;;  %v395_v54 = vadd.f32 %v1068_v7, %v134_v28  ;;  %v396_v59 = vadd.f32 %v1080_v12, %v135_v31  ;;  %v137_v43 = vld [vmem:[%s2292_s0 + $0x3f0] sm:$0xff] }
  0x5f   :  { %564 = vst [vmem:[%s2294_s2 + $0x3b0] sm:$0xff] %v390_v32  ;;  %565 = vst [vmem:[%s2294_s2 + $0x3b8] sm:$0xff] %v391_v35  ;;  %v397_v62 = vadd.f32 %v1088_v17, %v136_v33  ;;  %v138_v29 = vld [vmem:[%s2292_s0 + $0x3f8] sm:$0xff]  ;;  %v139_v9 = vld [vmem:[%s2292_s0 + $0x400] sm:$0xff]  ;;  %v398_v7 = vadd.f32 %v1104_v26, %v137_v43 }
  0x60   :  { %566 = vst [vmem:[%s2294_s2 + $0x3c0] sm:$0xff] %v392_v41  ;;  %567 = vst [vmem:[%s2294_s2 + $0x3c8] sm:$0xff] %v393_v45  ;;  %v399_v12 = vadd.f32 %v1116_v34, %v138_v29  ;;  %v400_v17 = vadd.f32 %v1124_v38, %v139_v9  ;;  %v140_v37 = vld [vmem:[%s2292_s0 + $0x408] sm:$0xff]  ;;  %v141_v40 = vld [vmem:[%s2292_s0 + $0x410] sm:$0xff] }
  0x61   :  { %568 = vst [vmem:[%s2294_s2 + $0x3d0] sm:$0xff] %v394_v48  ;;  %v142_v42 = vld [vmem:[%s2292_s0 + $0x418] sm:$0xff]  ;;  %569 = vst [vmem:[%s2294_s2 + $0x3d8] sm:$0xff] %v395_v54  ;;  %v401_v26 = vadd.f32 %v1140_v47, %v140_v37  ;;  %v402_v34 = vadd.f32 %v1152_v53, %v141_v40  ;;  %v143_v1 = vld [vmem:[%s2292_s0 + $0x420] sm:$0xff] }
  0x62   :  { %570 = vst [vmem:[%s2294_s2 + $0x3e0] sm:$0xff] %v396_v59  ;;  %571 = vst [vmem:[%s2294_s2 + $0x3e8] sm:$0xff] %v397_v62  ;;  %v403_v38 = vadd.f32 %v1160_v57, %v142_v42  ;;  %v144_v4 = vld [vmem:[%s2292_s0 + $0x428] sm:$0xff]  ;;  %v145_v6 = vld [vmem:[%s2292_s0 + $0x430] sm:$0xff]  ;;  %v404_v47 = vadd.f32 %v1176_v3, %v143_v1 }
  0x63   :  { %572 = vst [vmem:[%s2294_s2 + $0x3f0] sm:$0xff] %v398_v7  ;;  %573 = vst [vmem:[%s2294_s2 + $0x3f8] sm:$0xff] %v399_v12  ;;  %v405_v53 = vadd.f32 %v1188_v16, %v144_v4  ;;  %v406_v57 = vadd.f32 %v1196_v23, %v145_v6  ;;  %v146_v46 = vld [vmem:[%s2292_s0 + $0x438] sm:$0xff]  ;;  %v147_v49 = vld [vmem:[%s2292_s0 + $0x440] sm:$0xff] }
  0x64   :  { %574 = vst [vmem:[%s2294_s2 + $0x400] sm:$0xff] %v400_v17  ;;  %v148_v51 = vld [vmem:[%s2292_s0 + $0x448] sm:$0xff]  ;;  %575 = vst [vmem:[%s2294_s2 + $0x408] sm:$0xff] %v401_v26  ;;  %v407_v3 = vadd.f32 %v1212_v36, %v146_v46  ;;  %v408_v16 = vadd.f32 %v1224_v44, %v147_v49  ;;  %v149_v30 = vld [vmem:[%s2292_s0 + $0x450] sm:$0xff] }
  0x65   :  { %576 = vst [vmem:[%s2294_s2 + $0x410] sm:$0xff] %v402_v34  ;;  %577 = vst [vmem:[%s2294_s2 + $0x418] sm:$0xff] %v403_v38  ;;  %v409_v23 = vadd.f32 %v1232_v52, %v148_v51  ;;  %v150_v11 = vld [vmem:[%s2292_s0 + $0x458] sm:$0xff]  ;;  %v151_v39 = vld [vmem:[%s2292_s0 + $0x460] sm:$0xff]  ;;  %v410_v36 = vadd.f32 %v1248_v2, %v149_v30 }
  0x66   :  { %578 = vst [vmem:[%s2294_s2 + $0x420] sm:$0xff] %v404_v47  ;;  %579 = vst [vmem:[%s2294_s2 + $0x428] sm:$0xff] %v405_v53  ;;  %v2365_v44 = vld [vmem:[#allocation2_spill] sm:$0xff]  ;;  %v2366_v55 = vld [vmem:[#allocation3_spill] sm:$0xff] }
  0x67   :  { %580 = vst [vmem:[%s2294_s2 + $0x430] sm:$0xff] %v406_v57  ;;  %v411_v52 = vadd.f32 %v2365_v44, %v150_v11  ;;  %v412_v58 = vadd.f32 %v2366_v55, %v151_v39  ;;  %v152_v60 = vld [vmem:[%s2292_s0 + $0x468] sm:$0xff]  ;;  %v153_v10 = vld [vmem:[%s2292_s0 + $0x470] sm:$0xff]  ;;  %v154_v13 = vld [vmem:[%s2292_s0 + $0x478] sm:$0xff] }
  0x68   :  { %581 = vst [vmem:[%s2294_s2 + $0x438] sm:$0xff] %v407_v3  ;;  %582 = vst [vmem:[%s2294_s2 + $0x440] sm:$0xff] %v408_v16  ;;  %v2367_v2 = vld [vmem:[#allocation4_spill] sm:$0xff]  ;;  %v2368_v0 = vld [vmem:[#allocation5_spill] sm:$0xff] }
  0x69   :  { %583 = vst [vmem:[%s2294_s2 + $0x448] sm:$0xff] %v409_v23  ;;  %v413_v15 = vadd.f32 %v2367_v2, %v152_v60  ;;  %v414_v5 = vadd.f32 %v2368_v0, %v153_v10  ;;  %v2369_v8 = vld [vmem:[#allocation6_spill] sm:$0xff]  ;;  %v156_v50 = vld [vmem:[%s2292_s0 + $0x488] sm:$0xff]  ;;  %v157_v14 = vld [vmem:[%s2292_s0 + $0x490] sm:$0xff] }
  0x6a   :  { %v415_v20 = vadd.f32 %v2369_v8, %v154_v13  ;;  %v155_v25 = vld [vmem:[%s2292_s0 + $0x480] sm:$0xff]  ;;  %584 = vst [vmem:[%s2294_s2 + $0x450] sm:$0xff] %v410_v36  ;;  %585 = vst [vmem:[%s2294_s2 + $0x458] sm:$0xff] %v411_v52  ;;  %v2370_v18 = vld [vmem:[#allocation7_spill] sm:$0xff] }
  0x6b   :  { %586 = vst [vmem:[%s2294_s2 + $0x460] sm:$0xff] %v412_v58  ;;  %v416_v21 = vadd.f32 %v2370_v18, %v155_v25  ;;  %v2371_v19 = vld [vmem:[#allocation8_spill] sm:$0xff]  ;;  %v2372_v24 = vld [vmem:[#allocation9_spill] sm:$0xff]  ;;  %v159_v35 = vld [vmem:[%s2292_s0 + $0x4a0] sm:$0xff] }
  0x6c   :  { %v417_v22 = vadd.f32 %v2371_v19, %v156_v50  ;;  %v418_v27 = vadd.f32 %v2372_v24, %v157_v14  ;;  %v158_v32 = vld [vmem:[%s2292_s0 + $0x498] sm:$0xff]  ;;  %v160_v56 = vld [vmem:[%s2292_s0 + $0x4a8] sm:$0xff]  ;;  %587 = vst [vmem:[%s2294_s2 + $0x468] sm:$0xff] %v413_v15  ;;  %588 = vst [vmem:[%s2294_s2 + $0x470] sm:$0xff] %v414_v5 }
  0x6d   :  { %589 = vst [vmem:[%s2294_s2 + $0x478] sm:$0xff] %v415_v20  ;;  %v2373_v61 = vld [vmem:[#allocation10_spill] sm:$0xff]  ;;  %v2374_v41 = vld [vmem:[#allocation11_spill] sm:$0xff]  ;;  %v2375_v48 = vld [vmem:[#allocation12_spill] sm:$0xff] }
  0x6e   :  { %v419_v63 = vadd.f32 %v2373_v61, %v158_v32  ;;  %v420_v45 = vadd.f32 %v2374_v41, %v159_v35  ;;  %v421_v28 = vadd.f32 %v2375_v48, %v160_v56  ;;  %v161_v31 = vld [vmem:[%s2292_s0 + $0x4b0] sm:$0xff]  ;;  %v162_v33 = vld [vmem:[%s2292_s0 + $0x4b8] sm:$0xff]  ;;  %v163_v54 = vld [vmem:[%s2292_s0 + $0x4c0] sm:$0xff]  ;;  %590 = vst [vmem:[%s2294_s2 + $0x480] sm:$0xff] %v416_v21 }
  0x6f   :  { %591 = vst [vmem:[%s2294_s2 + $0x488] sm:$0xff] %v417_v22  ;;  %592 = vst [vmem:[%s2294_s2 + $0x490] sm:$0xff] %v418_v27  ;;  %v2376_v59 = vld [vmem:[#allocation13_spill] sm:$0xff]  ;;  %v2377_v43 = vld [vmem:[#allocation14_spill] sm:$0xff] }
  0x70   :  { %v422_v62 = vadd.f32 %v2376_v59, %v161_v31  ;;  %v423_v29 = vadd.f32 %v2377_v43, %v162_v33  ;;  %v2378_v9 = vld [vmem:[#allocation15_spill] sm:$0xff]  ;;  %v165_v17 = vld [vmem:[%s2292_s0 + $0x4d0] sm:$0xff]  ;;  %v166_v37 = vld [vmem:[%s2292_s0 + $0x4d8] sm:$0xff]  ;;  %593 = vst [vmem:[%s2294_s2 + $0x498] sm:$0xff] %v419_v63 }
  0x71   :  { %v424_v7 = vadd.f32 %v2378_v9, %v163_v54  ;;  %v164_v12 = vld [vmem:[%s2292_s0 + $0x4c8] sm:$0xff]  ;;  %594 = vst [vmem:[%s2294_s2 + $0x4a0] sm:$0xff] %v420_v45  ;;  %595 = vst [vmem:[%s2294_s2 + $0x4a8] sm:$0xff] %v421_v28  ;;  %v2379_v40 = vld [vmem:[#allocation16_spill] sm:$0xff] }
  0x72   :  { %v425_v42 = vadd.f32 %v2379_v40, %v164_v12  ;;  %v2380_v26 = vld [vmem:[#allocation17_spill] sm:$0xff]  ;;  %v2381_v38 = vld [vmem:[#allocation18_spill] sm:$0xff]  ;;  %v168_v6 = vld [vmem:[%s2292_s0 + $0x4e8] sm:$0xff]  ;;  %596 = vst [vmem:[%s2294_s2 + $0x4b0] sm:$0xff] %v422_v62 }
  0x73   :  { %v426_v34 = vadd.f32 %v2380_v26, %v165_v17  ;;  %v427_v1 = vadd.f32 %v2381_v38, %v166_v37  ;;  %v167_v4 = vld [vmem:[%s2292_s0 + $0x4e0] sm:$0xff]  ;;  %v169_v47 = vld [vmem:[%s2292_s0 + $0x4f0] sm:$0xff]  ;;  %597 = vst [vmem:[%s2294_s2 + $0x4b8] sm:$0xff] %v423_v29  ;;  %598 = vst [vmem:[%s2294_s2 + $0x4c0] sm:$0xff] %v424_v7 }
  0x74   :  { %v2382_v53 = vld [vmem:[#allocation19_spill] sm:$0xff]  ;;  %v2383_v46 = vld [vmem:[#allocation20_spill] sm:$0xff]  ;;  %v2384_v51 = vld [vmem:[#allocation21_spill] sm:$0xff]  ;;  %599 = vst [vmem:[%s2294_s2 + $0x4c8] sm:$0xff] %v425_v42 }
  0x75   :  { %v428_v57 = vadd.f32 %v2382_v53, %v167_v4  ;;  %v429_v49 = vadd.f32 %v2383_v46, %v168_v6  ;;  %v430_v3 = vadd.f32 %v2384_v51, %v169_v47  ;;  %v170_v16 = vld [vmem:[%s2292_s0 + $0x4f8] sm:$0xff]  ;;  %v171_v23 = vld [vmem:[%s2292_s0 + $0x500] sm:$0xff]  ;;  %v172_v30 = vld [vmem:[%s2292_s0 + $0x508] sm:$0xff]  ;;  %600 = vst [vmem:[%s2294_s2 + $0x4d0] sm:$0xff] %v426_v34 }
  0x76   :  { %601 = vst [vmem:[%s2294_s2 + $0x4d8] sm:$0xff] %v427_v1  ;;  %v2385_v11 = vld [vmem:[#allocation22_spill] sm:$0xff]  ;;  %v2386_v36 = vld [vmem:[#allocation23_spill] sm:$0xff]  ;;  %v2387_v52 = vld [vmem:[#allocation24_spill] sm:$0xff] }
  0x77   :  { %v431_v39 = vadd.f32 %v2385_v11, %v170_v16  ;;  %v432_v44 = vadd.f32 %v2386_v36, %v171_v23  ;;  %v433_v55 = vadd.f32 %v2387_v52, %v172_v30  ;;  %v173_v58 = vld [vmem:[%s2292_s0 + $0x510] sm:$0xff]  ;;  %v174_v60 = vld [vmem:[%s2292_s0 + $0x518] sm:$0xff]  ;;  %v175_v10 = vld [vmem:[%s2292_s0 + $0x520] sm:$0xff]  ;;  %602 = vst [vmem:[%s2294_s2 + $0x4e0] sm:$0xff] %v428_v57 }
  0x78   :  { %603 = vst [vmem:[%s2294_s2 + $0x4e8] sm:$0xff] %v429_v49  ;;  %604 = vst [vmem:[%s2294_s2 + $0x4f0] sm:$0xff] %v430_v3  ;;  %v2388_v13 = vld [vmem:[#allocation25_spill] sm:$0xff]  ;;  %v2389_v15 = vld [vmem:[#allocation26_spill] sm:$0xff] }
  0x79   :  { %v434_v2 = vadd.f32 %v2388_v13, %v173_v58  ;;  %v435_v0 = vadd.f32 %v2389_v15, %v174_v60  ;;  %v2390_v5 = vld [vmem:[#allocation27_spill] sm:$0xff]  ;;  %v177_v25 = vld [vmem:[%s2292_s0 + $0x530] sm:$0xff]  ;;  %v178_v50 = vld [vmem:[%s2292_s0 + $0x538] sm:$0xff]  ;;  %605 = vst [vmem:[%s2294_s2 + $0x4f8] sm:$0xff] %v431_v39 }
  0x7a   :  { %v436_v8 = vadd.f32 %v2390_v5, %v175_v10  ;;  %v176_v20 = vld [vmem:[%s2292_s0 + $0x528] sm:$0xff]  ;;  %606 = vst [vmem:[%s2294_s2 + $0x500] sm:$0xff] %v432_v44  ;;  %607 = vst [vmem:[%s2294_s2 + $0x508] sm:$0xff] %v433_v55  ;;  %v2391_v14 = vld [vmem:[#allocation28_spill] sm:$0xff] }
  0x7b   :  { %v437_v18 = vadd.f32 %v2391_v14, %v176_v20  ;;  %v2392_v21 = vld [vmem:[#allocation29_spill] sm:$0xff]  ;;  %v2393_v22 = vld [vmem:[#allocation30_spill] sm:$0xff]  ;;  %v180_v32 = vld [vmem:[%s2292_s0 + $0x548] sm:$0xff]  ;;  %608 = vst [vmem:[%s2294_s2 + $0x510] sm:$0xff] %v434_v2 }
  0x7c   :  { %v438_v19 = vadd.f32 %v2392_v21, %v177_v25  ;;  %v439_v24 = vadd.f32 %v2393_v22, %v178_v50  ;;  %v179_v27 = vld [vmem:[%s2292_s0 + $0x540] sm:$0xff]  ;;  %v181_v35 = vld [vmem:[%s2292_s0 + $0x550] sm:$0xff]  ;;  %609 = vst [vmem:[%s2294_s2 + $0x518] sm:$0xff] %v435_v0  ;;  %610 = vst [vmem:[%s2294_s2 + $0x520] sm:$0xff] %v436_v8 }
  0x7d   :  { %v2394_v56 = vld [vmem:[#allocation31_spill] sm:$0xff]  ;;  %v2395_v63 = vld [vmem:[#allocation32_spill] sm:$0xff]  ;;  %v2396_v45 = vld [vmem:[#allocation33_spill] sm:$0xff]  ;;  %611 = vst [vmem:[%s2294_s2 + $0x528] sm:$0xff] %v437_v18 }
  0x7e   :  { %v440_v61 = vadd.f32 %v2394_v56, %v179_v27  ;;  %v441_v41 = vadd.f32 %v2395_v63, %v180_v32  ;;  %v442_v48 = vadd.f32 %v2396_v45, %v181_v35  ;;  %v182_v28 = vld [vmem:[%s2292_s0 + $0x558] sm:$0xff]  ;;  %v183_v31 = vld [vmem:[%s2292_s0 + $0x560] sm:$0xff]  ;;  %v184_v33 = vld [vmem:[%s2292_s0 + $0x568] sm:$0x3]  ;;  %612 = vst [vmem:[%s2294_s2 + $0x530] sm:$0xff] %v438_v19 }
  0x7f   :  { %613 = vst [vmem:[%s2294_s2 + $0x538] sm:$0xff] %v439_v24  ;;  %v2397_v54 = vld [vmem:[#allocation34_spill] sm:$0xff]  ;;  %v2398_v62 = vld [vmem:[#allocation35_spill] sm:$0xff]  ;;  %v2399_v29 = vld [vmem:[#allocation36_spill] sm:$0xff] }
  0x80   :  { %v443_v59 = vadd.f32 %v2397_v54, %v182_v28  ;;  %v444_v43 = vadd.f32 %v2398_v62, %v183_v31  ;;  %v445_v9 = vadd.f32 %v2399_v29, %v184_v33  ;;  %614 = vst [vmem:[%s2294_s2 + $0x540] sm:$0xff] %v440_v61  ;;  %615 = vst [vmem:[%s2294_s2 + $0x548] sm:$0xff] %v441_v41 }
  0x81   :  { %616 = vst [vmem:[%s2294_s2 + $0x550] sm:$0xff] %v442_v48 }
  0x82   :  { %617 = vst [vmem:[%s2294_s2 + $0x558] sm:$0xff] %v443_v59  ;;  %618 = vst [vmem:[%s2294_s2 + $0x560] sm:$0xff] %v444_v43 }
  0x83   :  { %619 = vst [vmem:[%s2294_s2 + $0x568] sm:$0x3] %v445_v9 }

// kernel: tpu_custom_call.1
= control target key start
LH: loop header
LB: loop body
LE: loop exit
PB: predicated region body
PF: predicated region fallthrough
CT: control target
= control target key end

     0   :  { %s2292_s0 = inlined_call_operand.vmem [shape: f32[2,690,128], index: 0, kind: input, shape index: {}]   ;;  %s2293_s1 = inlined_call_operand.vmem [shape: f32[1,690,128], index: 1, kind: input, shape index: {}]   ;;  %s2294_s2 = inlined_call_operand.vmem [shape: f32[2,690,128], index: 2, kind: output, shape index: {}]  }
   0x1   :  { %v11_v0 = vld [vmem:[%s2292_s0] sm:$0xff]  ;;  %v12_v2 = vld [vmem:[%s2292_s0 + $0x8] sm:$0xff]  ;;  %v13_v5 = vld [vmem:[%s2292_s0 + $0x10] sm:$0xff] }
   0x2   :  { %v645_v1 = vld [vmem:[%s2293_s1] sm:$0xff]  ;;  %v654_v4 = vld [vmem:[%s2293_s1 + $0x8] sm:$0xff]  ;;  %v662_v6 = vld [vmem:[%s2293_s1 + $0x10] sm:$0xff] }
   0x3   :  { %v272_v3 = vadd.f32 %v645_v1, %v11_v0  ;;  %v273_v7 = vadd.f32 %v654_v4, %v12_v2  ;;  %v274_v8 = vadd.f32 %v662_v6, %v13_v5  ;;  %v14_v9 = vld [vmem:[%s2292_s0 + $0x18] sm:$0xff]  ;;  %v15_v11 = vld [vmem:[%s2292_s0 + $0x20] sm:$0xff]  ;;  %v16_v14 = vld [vmem:[%s2292_s0 + $0x28] sm:$0xff] }
   0x4   :  { %v672_v10 = vld [vmem:[%s2293_s1 + $0x18] sm:$0xff]  ;;  %v684_v13 = vld [vmem:[%s2293_s1 + $0x20] sm:$0xff]  ;;  %v692_v15 = vld [vmem:[%s2293_s1 + $0x28] sm:$0xff] }
   0x5   :  { %446 = vst [vmem:[%s2294_s2] sm:$0xff] %v272_v3  ;;  %v275_v12 = vadd.f32 %v672_v10, %v14_v9  ;;  %447 = vst [vmem:[%s2294_s2 + $0x8] sm:$0xff] %v273_v7  ;;  %v276_v16 = vadd.f32 %v684_v13, %v15_v11  ;;  %v277_v17 = vadd.f32 %v692_v15, %v16_v14  ;;  %v17_v18 = vld [vmem:[%s2292_s0 + $0x30] sm:$0xff]  ;;  %v18_v20 = vld [vmem:[%s2292_s0 + $0x38] sm:$0xff] }
   0x6   :  { %448 = vst [vmem:[%s2294_s2 + $0x10] sm:$0xff] %v274_v8  ;;  %v708_v19 = vld [vmem:[%s2293_s1 + $0x30] sm:$0xff]  ;;  %v720_v22 = vld [vmem:[%s2293_s1 + $0x38] sm:$0xff]  ;;  %v19_v23 = vld [vmem:[%s2292_s0 + $0x40] sm:$0xff] }
   0x7   :  { %449 = vst [vmem:[%s2294_s2 + $0x18] sm:$0xff] %v275_v12  ;;  %v278_v21 = vadd.f32 %v708_v19, %v17_v18  ;;  %v728_v24 = vld [vmem:[%s2293_s1 + $0x40] sm:$0xff]  ;;  %450 = vst [vmem:[%s2294_s2 + $0x20] sm:$0xff] %v276_v16  ;;  %v279_v25 = vadd.f32 %v720_v22, %v18_v20  ;;  %v20_v27 = vld [vmem:[%s2292_s0 + $0x48] sm:$0xff] }
   0x8   :  { %451 = vst [vmem:[%s2294_s2 + $0x28] sm:$0xff] %v277_v17  ;;  %v280_v26 = vadd.f32 %v728_v24, %v19_v23  ;;  %v744_v28 = vld [vmem:[%s2293_s1 + $0x48] sm:$0xff]  ;;  %v21_v29 = vld [vmem:[%s2292_s0 + $0x50] sm:$0xff]  ;;  %v22_v32 = vld [vmem:[%s2292_s0 + $0x58] sm:$0xff] }
   0x9   :  { %452 = vst [vmem:[%s2294_s2 + $0x30] sm:$0xff] %v278_v21  ;;  %v281_v30 = vadd.f32 %v744_v28, %v20_v27  ;;  %v756_v31 = vld [vmem:[%s2293_s1 + $0x50] sm:$0xff]  ;;  %v764_v33 = vld [vmem:[%s2293_s1 + $0x58] sm:$0xff]  ;;  %453 = vst [vmem:[%s2294_s2 + $0x38] sm:$0xff] %v279_v25 }
   0xa   :  { %454 = vst [vmem:[%s2294_s2 + $0x40] sm:$0xff] %v280_v26  ;;  %v282_v34 = vadd.f32 %v756_v31, %v21_v29  ;;  %v283_v35 = vadd.f32 %v764_v33, %v22_v32  ;;  %v23_v36 = vld [vmem:[%s2292_s0 + $0x60] sm:$0xff]  ;;  %v24_v38 = vld [vmem:[%s2292_s0 + $0x68] sm:$0xff]  ;;  %v25_v41 = vld [vmem:[%s2292_s0 + $0x70] sm:$0xff] }
   0xb   :  { %v780_v37 = vld [vmem:[%s2293_s1 + $0x60] sm:$0xff]  ;;  %455 = vst [vmem:[%s2294_s2 + $0x48] sm:$0xff] %v281_v30  ;;  %v792_v40 = vld [vmem:[%s2293_s1 + $0x68] sm:$0xff]  ;;  %v800_v42 = vld [vmem:[%s2293_s1 + $0x70] sm:$0xff] }
   0xc   :  { %v284_v39 = vadd.f32 %v780_v37, %v23_v36  ;;  %456 = vst [vmem:[%s2294_s2 + $0x50] sm:$0xff] %v282_v34  ;;  %457 = vst [vmem:[%s2294_s2 + $0x58] sm:$0xff] %v283_v35  ;;  %v285_v43 = vadd.f32 %v792_v40, %v24_v38  ;;  %v286_v44 = vadd.f32 %v800_v42, %v25_v41  ;;  %v26_v45 = vld [vmem:[%s2292_s0 + $0x78] sm:$0xff]  ;;  %v27_v47 = vld [vmem:[%s2292_s0 + $0x80] sm:$0xff] }
   0xd   :  { %v816_v46 = vld [vmem:[%s2293_s1 + $0x78] sm:$0xff]  ;;  %v828_v49 = vld [vmem:[%s2293_s1 + $0x80] sm:$0xff]  ;;  %v28_v50 = vld [vmem:[%s2292_s0 + $0x88] sm:$0xff] }
   0xe   :  { %458 = vst [vmem:[%s2294_s2 + $0x60] sm:$0xff] %v284_v39  ;;  %v287_v48 = vadd.f32 %v816_v46, %v26_v45  ;;  %v836_v51 = vld [vmem:[%s2293_s1 + $0x88] sm:$0xff]  ;;  %459 = vst [vmem:[%s2294_s2 + $0x68] sm:$0xff] %v285_v43  ;;  %v288_v52 = vadd.f32 %v828_v49, %v27_v47  ;;  %v29_v54 = vld [vmem:[%s2292_s0 + $0x90] sm:$0xff] }
   0xf   :  { %460 = vst [vmem:[%s2294_s2 + $0x70] sm:$0xff] %v286_v44  ;;  %v289_v53 = vadd.f32 %v836_v51, %v28_v50  ;;  %v852_v55 = vld [vmem:[%s2293_s1 + $0x90] sm:$0xff]  ;;  %v30_v56 = vld [vmem:[%s2292_s0 + $0x98] sm:$0xff]  ;;  %v31_v59 = vld [vmem:[%s2292_s0 + $0xa0] sm:$0xff] }
  0x10   :  { %461 = vst [vmem:[%s2294_s2 + $0x78] sm:$0xff] %v287_v48  ;;  %v290_v57 = vadd.f32 %v852_v55, %v29_v54  ;;  %v864_v58 = vld [vmem:[%s2293_s1 + $0x98] sm:$0xff]  ;;  %v872_v60 = vld [vmem:[%s2293_s1 + $0xa0] sm:$0xff]  ;;  %462 = vst [vmem:[%s2294_s2 + $0x80] sm:$0xff] %v288_v52 }
  0x11   :  { %463 = vst [vmem:[%s2294_s2 + $0x88] sm:$0xff] %v289_v53  ;;  %v291_v61 = vadd.f32 %v864_v58, %v30_v56  ;;  %v292_v62 = vadd.f32 %v872_v60, %v31_v59  ;;  %v32_v63 = vld [vmem:[%s2292_s0 + $0xa8] sm:$0xff]  ;;  %v33_v2 = vld [vmem:[%s2292_s0 + $0xb0] sm:$0xff]  ;;  %v34_v7 = vld [vmem:[%s2292_s0 + $0xb8] sm:$0xff] }
  0x12   :  { %v888_v0 = vld [vmem:[%s2293_s1 + $0xa8] sm:$0xff]  ;;  %464 = vst [vmem:[%s2294_s2 + $0x90] sm:$0xff] %v290_v57  ;;  %v900_v5 = vld [vmem:[%s2293_s1 + $0xb0] sm:$0xff]  ;;  %v908_v8 = vld [vmem:[%s2293_s1 + $0xb8] sm:$0xff] }
  0x13   :  { %v293_v3 = vadd.f32 %v888_v0, %v32_v63  ;;  %465 = vst [vmem:[%s2294_s2 + $0x98] sm:$0xff] %v291_v61  ;;  %466 = vst [vmem:[%s2294_s2 + $0xa0] sm:$0xff] %v292_v62  ;;  %v294_v9 = vadd.f32 %v900_v5, %v33_v2  ;;  %v295_v11 = vadd.f32 %v908_v8, %v34_v7  ;;  %v35_v12 = vld [vmem:[%s2292_s0 + $0xc0] sm:$0xff]  ;;  %v36_v16 = vld [vmem:[%s2292_s0 + $0xc8] sm:$0xff] }
  0x14   :  { %v924_v14 = vld [vmem:[%s2293_s1 + $0xc0] sm:$0xff]  ;;  %v936_v18 = vld [vmem:[%s2293_s1 + $0xc8] sm:$0xff]  ;;  %v37_v20 = vld [vmem:[%s2292_s0 + $0xd0] sm:$0xff] }
  0x15   :  { %467 = vst [vmem:[%s2294_s2 + $0xa8] sm:$0xff] %v293_v3  ;;  %v296_v17 = vadd.f32 %v924_v14, %v35_v12  ;;  %v944_v21 = vld [vmem:[%s2293_s1 + $0xd0] sm:$0xff]  ;;  %468 = vst [vmem:[%s2294_s2 + $0xb0] sm:$0xff] %v294_v9  ;;  %v297_v23 = vadd.f32 %v936_v18, %v36_v16  ;;  %v38_v26 = vld [vmem:[%s2292_s0 + $0xd8] sm:$0xff] }
  0x16   :  { %469 = vst [vmem:[%s2294_s2 + $0xb8] sm:$0xff] %v295_v11  ;;  %v298_v25 = vadd.f32 %v944_v21, %v37_v20  ;;  %v960_v27 = vld [vmem:[%s2293_s1 + $0xd8] sm:$0xff]  ;;  %v39_v29 = vld [vmem:[%s2292_s0 + $0xe0] sm:$0xff]  ;;  %v40_v34 = vld [vmem:[%s2292_s0 + $0xe8] sm:$0xff] }
  0x17   :  { %470 = vst [vmem:[%s2294_s2 + $0xc0] sm:$0xff] %v296_v17  ;;  %v299_v30 = vadd.f32 %v960_v27, %v38_v26  ;;  %v972_v32 = vld [vmem:[%s2293_s1 + $0xe0] sm:$0xff]  ;;  %v980_v35 = vld [vmem:[%s2293_s1 + $0xe8] sm:$0xff]  ;;  %471 = vst [vmem:[%s2294_s2 + $0xc8] sm:$0xff] %v297_v23 }
  0x18   :  { %472 = vst [vmem:[%s2294_s2 + $0xd0] sm:$0xff] %v298_v25  ;;  %v300_v36 = vadd.f32 %v972_v32, %v39_v29  ;;  %v301_v38 = vadd.f32 %v980_v35, %v40_v34  ;;  %v41_v39 = vld [vmem:[%s2292_s0 + $0xf0] sm:$0xff]  ;;  %v42_v43 = vld [vmem:[%s2292_s0 + $0xf8] sm:$0xff]  ;;  %v43_v47 = vld [vmem:[%s2292_s0 + $0x100] sm:$0xff] }
  0x19   :  { %v996_v41 = vld [vmem:[%s2293_s1 + $0xf0] sm:$0xff]  ;;  %473 = vst [vmem:[%s2294_s2 + $0xd8] sm:$0xff] %v299_v30  ;;  %v1008_v45 = vld [vmem:[%s2293_s1 + $0xf8] sm:$0xff]  ;;  %v1016_v48 = vld [vmem:[%s2293_s1 + $0x100] sm:$0xff] }
  0x1a   :  { %v302_v44 = vadd.f32 %v996_v41, %v41_v39  ;;  %474 = vst [vmem:[%s2294_s2 + $0xe0] sm:$0xff] %v300_v36  ;;  %475 = vst [vmem:[%s2294_s2 + $0xe8] sm:$0xff] %v301_v38  ;;  %v303_v50 = vadd.f32 %v1008_v45, %v42_v43  ;;  %v304_v52 = vadd.f32 %v1016_v48, %v43_v47  ;;  %v44_v53 = vld [vmem:[%s2292_s0 + $0x108] sm:$0xff]  ;;  %v45_v56 = vld [vmem:[%s2292_s0 + $0x110] sm:$0xff] }
  0x1b   :  { %v1032_v54 = vld [vmem:[%s2293_s1 + $0x108] sm:$0xff]  ;;  %v1044_v59 = vld [vmem:[%s2293_s1 + $0x110] sm:$0xff]  ;;  %v46_v61 = vld [vmem:[%s2292_s0 + $0x118] sm:$0xff] }
  0x1c   :  { %476 = vst [vmem:[%s2294_s2 + $0xf0] sm:$0xff] %v302_v44  ;;  %v305_v57 = vadd.f32 %v1032_v54, %v44_v53  ;;  %v1052_v62 = vld [vmem:[%s2293_s1 + $0x118] sm:$0xff]  ;;  %477 = vst [vmem:[%s2294_s2 + $0xf8] sm:$0xff] %v303_v50  ;;  %v306_v63 = vadd.f32 %v1044_v59, %v45_v56  ;;  %v47_v3 = vld [vmem:[%s2292_s0 + $0x120] sm:$0xff] }
  0x1d   :  { %478 = vst [vmem:[%s2294_s2 + $0x100] sm:$0xff] %v304_v52  ;;  %v307_v2 = vadd.f32 %v1052_v62, %v46_v61  ;;  %v1068_v7 = vld [vmem:[%s2293_s1 + $0x120] sm:$0xff]  ;;  %v48_v9 = vld [vmem:[%s2292_s0 + $0x128] sm:$0xff]  ;;  %v49_v16 = vld [vmem:[%s2292_s0 + $0x130] sm:$0xff] }
  0x1e   :  { %479 = vst [vmem:[%s2294_s2 + $0x108] sm:$0xff] %v305_v57  ;;  %v308_v11 = vadd.f32 %v1068_v7, %v47_v3  ;;  %v1080_v12 = vld [vmem:[%s2293_s1 + $0x128] sm:$0xff]  ;;  %v1088_v17 = vld [vmem:[%s2293_s1 + $0x130] sm:$0xff]  ;;  %480 = vst [vmem:[%s2294_s2 + $0x110] sm:$0xff] %v306_v63 }
  0x1f   :  { %481 = vst [vmem:[%s2294_s2 + $0x118] sm:$0xff] %v307_v2  ;;  %v309_v20 = vadd.f32 %v1080_v12, %v48_v9  ;;  %v310_v23 = vadd.f32 %v1088_v17, %v49_v16  ;;  %v50_v25 = vld [vmem:[%s2292_s0 + $0x138] sm:$0xff]  ;;  %v51_v29 = vld [vmem:[%s2292_s0 + $0x140] sm:$0xff]  ;;  %v52_v36 = vld [vmem:[%s2292_s0 + $0x148] sm:$0xff] }
  0x20   :  { %v1104_v26 = vld [vmem:[%s2293_s1 + $0x138] sm:$0xff]  ;;  %482 = vst [vmem:[%s2294_s2 + $0x120] sm:$0xff] %v308_v11  ;;  %v1116_v34 = vld [vmem:[%s2293_s1 + $0x140] sm:$0xff]  ;;  %v1124_v38 = vld [vmem:[%s2293_s1 + $0x148] sm:$0xff] }
  0x21   :  { %v311_v30 = vadd.f32 %v1104_v26, %v50_v25  ;;  %483 = vst [vmem:[%s2294_s2 + $0x128] sm:$0xff] %v309_v20  ;;  %484 = vst [vmem:[%s2294_s2 + $0x130] sm:$0xff] %v310_v23  ;;  %v312_v39 = vadd.f32 %v1116_v34, %v51_v29  ;;  %v313_v43 = vadd.f32 %v1124_v38, %v52_v36  ;;  %v53_v44 = vld [vmem:[%s2292_s0 + $0x150] sm:$0xff]  ;;  %v54_v50 = vld [vmem:[%s2292_s0 + $0x158] sm:$0xff] }
  0x22   :  { %v1140_v47 = vld [vmem:[%s2293_s1 + $0x150] sm:$0xff]  ;;  %v1152_v53 = vld [vmem:[%s2293_s1 + $0x158] sm:$0xff]  ;;  %v55_v56 = vld [vmem:[%s2292_s0 + $0x160] sm:$0xff] }
  0x23   :  { %485 = vst [vmem:[%s2294_s2 + $0x138] sm:$0xff] %v311_v30  ;;  %v314_v52 = vadd.f32 %v1140_v47, %v53_v44  ;;  %v1160_v57 = vld [vmem:[%s2293_s1 + $0x160] sm:$0xff]  ;;  %486 = vst [vmem:[%s2294_s2 + $0x140] sm:$0xff] %v312_v39  ;;  %v315_v61 = vadd.f32 %v1152_v53, %v54_v50  ;;  %v56_v2 = vld [vmem:[%s2292_s0 + $0x168] sm:$0xff] }
  0x24   :  { %487 = vst [vmem:[%s2294_s2 + $0x148] sm:$0xff] %v313_v43  ;;  %v316_v63 = vadd.f32 %v1160_v57, %v55_v56  ;;  %v1176_v3 = vld [vmem:[%s2293_s1 + $0x168] sm:$0xff]  ;;  %v57_v9 = vld [vmem:[%s2292_s0 + $0x170] sm:$0xff]  ;;  %v58_v20 = vld [vmem:[%s2292_s0 + $0x178] sm:$0xff] }
  0x25   :  { %488 = vst [vmem:[%s2294_s2 + $0x150] sm:$0xff] %v314_v52  ;;  %v317_v11 = vadd.f32 %v1176_v3, %v56_v2  ;;  %v1188_v16 = vld [vmem:[%s2293_s1 + $0x170] sm:$0xff]  ;;  %v1196_v23 = vld [vmem:[%s2293_s1 + $0x178] sm:$0xff]  ;;  %489 = vst [vmem:[%s2294_s2 + $0x158] sm:$0xff] %v315_v61 }
  0x26   :  { %490 = vst [vmem:[%s2294_s2 + $0x160] sm:$0xff] %v316_v63  ;;  %v318_v25 = vadd.f32 %v1188_v16, %v57_v9  ;;  %v319_v29 = vadd.f32 %v1196_v23, %v58_v20  ;;  %v59_v30 = vld [vmem:[%s2292_s0 + $0x180] sm:$0xff]  ;;  %v60_v39 = vld [vmem:[%s2292_s0 + $0x188] sm:$0xff]  ;;  %v61_v50 = vld [vmem:[%s2292_s0 + $0x190] sm:$0xff] }
  0x27   :  { %v1212_v36 = vld [vmem:[%s2293_s1 + $0x180] sm:$0xff]  ;;  %491 = vst [vmem:[%s2294_s2 + $0x168] sm:$0xff] %v317_v11  ;;  %v1224_v44 = vld [vmem:[%s2293_s1 + $0x188] sm:$0xff]  ;;  %v1232_v52 = vld [vmem:[%s2293_s1 + $0x190] sm:$0xff] }
  0x28   :  { %v320_v43 = vadd.f32 %v1212_v36, %v59_v30  ;;  %492 = vst [vmem:[%s2294_s2 + $0x170] sm:$0xff] %v318_v25  ;;  %493 = vst [vmem:[%s2294_s2 + $0x178] sm:$0xff] %v319_v29  ;;  %v321_v56 = vadd.f32 %v1224_v44, %v60_v39  ;;  %v322_v61 = vadd.f32 %v1232_v52, %v61_v50  ;;  %v62_v63 = vld [vmem:[%s2292_s0 + $0x198] sm:$0xff]  ;;  %v63_v9 = vld [vmem:[%s2292_s0 + $0x1a0] sm:$0xff] }
  0x29   :  { %v1248_v2 = vld [vmem:[%s2293_s1 + $0x198] sm:$0xff]  ;;  %v1260_v20 = vld [vmem:[%s2293_s1 + $0x1a0] sm:$0xff]  ;;  %v64_v25 = vld [vmem:[%s2292_s0 + $0x1a8] sm:$0xff] }
  0x2a   :  { %494 = vst [vmem:[%s2294_s2 + $0x180] sm:$0xff] %v320_v43  ;;  %v323_v11 = vadd.f32 %v1248_v2, %v62_v63  ;;  %2330 = vst [vmem:[#allocation2_spill] sm:$0xff] %v1260_v20  ;;  %v1268_v29 = vld [vmem:[%s2293_s1 + $0x1a8] sm:$0xff]  ;;  %v324_v30 = vadd.f32 %v1260_v20, %v63_v9  ;;  %v65_v43 = vld [vmem:[%s2292_s0 + $0x1b0] sm:$0xff] }
  0x2b   :  { %2331 = vst [vmem:[#allocation3_spill] sm:$0xff] %v1268_v29  ;;  %495 = vst [vmem:[%s2294_s2 + $0x188] sm:$0xff] %v321_v56  ;;  %v325_v39 = vadd.f32 %v1268_v29, %v64_v25  ;;  %v1284_v50 = vld [vmem:[%s2293_s1 + $0x1b0] sm:$0xff]  ;;  %v66_v56 = vld [vmem:[%s2292_s0 + $0x1b8] sm:$0xff] }
  0x2c   :  { %496 = vst [vmem:[%s2294_s2 + $0x190] sm:$0xff] %v322_v61  ;;  %2332 = vst [vmem:[#allocation4_spill] sm:$0xff] %v1284_v50  ;;  %v326_v61 = vadd.f32 %v1284_v50, %v65_v43  ;;  %v1296_v63 = vld [vmem:[%s2293_s1 + $0x1b8] sm:$0xff]  ;;  %v67_v9 = vld [vmem:[%s2292_s0 + $0x1c0] sm:$0xff] }
  0x2d   :  { %497 = vst [vmem:[%s2294_s2 + $0x198] sm:$0xff] %v323_v11  ;;  %2333 = vst [vmem:[#allocation5_spill] sm:$0xff] %v1296_v63  ;;  %v1304_v25 = vld [vmem:[%s2293_s1 + $0x1c0] sm:$0xff]  ;;  %v327_v11 = vadd.f32 %v1296_v63, %v66_v56  ;;  %v68_v50 = vld [vmem:[%s2292_s0 + $0x1c8] sm:$0xff] }
  0x2e   :  { %2334 = vst [vmem:[#allocation6_spill] sm:$0xff] %v1304_v25  ;;  %498 = vst [vmem:[%s2294_s2 + $0x1a0] sm:$0xff] %v324_v30  ;;  %v328_v43 = vadd.f32 %v1304_v25, %v67_v9  ;;  %v1320_v29 = vld [vmem:[%s2293_s1 + $0x1c8] sm:$0xff]  ;;  %v69_v30 = vld [vmem:[%s2292_s0 + $0x1d0] sm:$0xff] }
  0x2f   :  { %499 = vst [vmem:[%s2294_s2 + $0x1a8] sm:$0xff] %v325_v39  ;;  %2335 = vst [vmem:[#allocation7_spill] sm:$0xff] %v1320_v29  ;;  %v329_v39 = vadd.f32 %v1320_v29, %v68_v50  ;;  %v1332_v56 = vld [vmem:[%s2293_s1 + $0x1d0] sm:$0xff]  ;;  %v70_v9 = vld [vmem:[%s2292_s0 + $0x1d8] sm:$0xff] }
  0x30   :  { %500 = vst [vmem:[%s2294_s2 + $0x1b0] sm:$0xff] %v326_v61  ;;  %2336 = vst [vmem:[#allocation8_spill] sm:$0xff] %v1332_v56  ;;  %v1340_v25 = vld [vmem:[%s2293_s1 + $0x1d8] sm:$0xff]  ;;  %v330_v50 = vadd.f32 %v1332_v56, %v69_v30  ;;  %v71_v29 = vld [vmem:[%s2292_s0 + $0x1e0] sm:$0xff] }
  0x31   :  { %2337 = vst [vmem:[#allocation9_spill] sm:$0xff] %v1340_v25  ;;  %501 = vst [vmem:[%s2294_s2 + $0x1b8] sm:$0xff] %v327_v11  ;;  %v331_v61 = vadd.f32 %v1340_v25, %v70_v9  ;;  %v1356_v63 = vld [vmem:[%s2293_s1 + $0x1e0] sm:$0xff]  ;;  %v72_v11 = vld [vmem:[%s2292_s0 + $0x1e8] sm:$0xff] }
  0x32   :  { %502 = vst [vmem:[%s2294_s2 + $0x1c0] sm:$0xff] %v328_v43  ;;  %2338 = vst [vmem:[#allocation10_spill] sm:$0xff] %v1356_v63  ;;  %v332_v43 = vadd.f32 %v1356_v63, %v71_v29  ;;  %v1368_v30 = vld [vmem:[%s2293_s1 + $0x1e8] sm:$0xff]  ;;  %v73_v9 = vld [vmem:[%s2292_s0 + $0x1f0] sm:$0xff] }
  0x33   :  { %503 = vst [vmem:[%s2294_s2 + $0x1c8] sm:$0xff] %v329_v39  ;;  %2339 = vst [vmem:[#allocation11_spill] sm:$0xff] %v1368_v30  ;;  %v1376_v25 = vld [vmem:[%s2293_s1 + $0x1f0] sm:$0xff]  ;;  %v333_v29 = vadd.f32 %v1368_v30, %v72_v11  ;;  %v74_v63 = vld [vmem:[%s2292_s0 + $0x1f8] sm:$0xff] }
  0x34   :  { %2340 = vst [vmem:[#allocation12_spill] sm:$0xff] %v1376_v25  ;;  %504 = vst [vmem:[%s2294_s2 + $0x1d0] sm:$0xff] %v330_v50  ;;  %v334_v39 = vadd.f32 %v1376_v25, %v73_v9  ;;  %v1392_v56 = vld [vmem:[%s2293_s1 + $0x1f8] sm:$0xff]  ;;  %v75_v50 = vld [vmem:[%s2292_s0 + $0x200] sm:$0xff] }
  0x35   :  { %505 = vst [vmem:[%s2294_s2 + $0x1d8] sm:$0xff] %v331_v61  ;;  %2341 = vst [vmem:[#allocation13_spill] sm:$0xff] %v1392_v56  ;;  %v335_v61 = vadd.f32 %v1392_v56, %v74_v63  ;;  %v1404_v11 = vld [vmem:[%s2293_s1 + $0x200] sm:$0xff]  ;;  %v76_v9 = vld [vmem:[%s2292_s0 + $0x208] sm:$0xff] }
  0x36   :  { %506 = vst [vmem:[%s2294_s2 + $0x1e0] sm:$0xff] %v332_v43  ;;  %2342 = vst [vmem:[#allocation14_spill] sm:$0xff] %v1404_v11  ;;  %v1412_v25 = vld [vmem:[%s2293_s1 + $0x208] sm:$0xff]  ;;  %v336_v63 = vadd.f32 %v1404_v11, %v75_v50  ;;  %v77_v56 = vld [vmem:[%s2292_s0 + $0x210] sm:$0xff] }
  0x37   :  { %2343 = vst [vmem:[#allocation15_spill] sm:$0xff] %v1412_v25  ;;  %507 = vst [vmem:[%s2294_s2 + $0x1e8] sm:$0xff] %v333_v29  ;;  %v337_v43 = vadd.f32 %v1412_v25, %v76_v9  ;;  %v1428_v30 = vld [vmem:[%s2293_s1 + $0x210] sm:$0xff]  ;;  %v78_v29 = vld [vmem:[%s2292_s0 + $0x218] sm:$0xff] }
  0x38   :  { %508 = vst [vmem:[%s2294_s2 + $0x1f0] sm:$0xff] %v334_v39  ;;  %2344 = vst [vmem:[#allocation16_spill] sm:$0xff] %v1428_v30  ;;  %v338_v39 = vadd.f32 %v1428_v30, %v77_v56  ;;  %v1440_v50 = vld [vmem:[%s2293_s1 + $0x218] sm:$0xff]  ;;  %v79_v9 = vld [vmem:[%s2292_s0 + $0x220] sm:$0xff] }
  0x39   :  { %509 = vst [vmem:[%s2294_s2 + $0x1f8] sm:$0xff] %v335_v61  ;;  %2345 = vst [vmem:[#allocation17_spill] sm:$0xff] %v1440_v50  ;;  %v1448_v25 = vld [vmem:[%s2293_s1 + $0x220] sm:$0xff]  ;;  %v339_v56 = vadd.f32 %v1440_v50, %v78_v29  ;;  %v80_v30 = vld [vmem:[%s2292_s0 + $0x228] sm:$0xff] }
  0x3a   :  { %2346 = vst [vmem:[#allocation18_spill] sm:$0xff] %v1448_v25  ;;  %510 = vst [vmem:[%s2294_s2 + $0x200] sm:$0xff] %v336_v63  ;;  %v340_v61 = vadd.f32 %v1448_v25, %v79_v9  ;;  %v1464_v11 = vld [vmem:[%s2293_s1 + $0x228] sm:$0xff]  ;;  %v81_v63 = vld [vmem:[%s2292_s0 + $0x230] sm:$0xff] }
  0x3b   :  { %511 = vst [vmem:[%s2294_s2 + $0x208] sm:$0xff] %v337_v43  ;;  %2347 = vst [vmem:[#allocation19_spill] sm:$0xff] %v1464_v11  ;;  %v341_v43 = vadd.f32 %v1464_v11, %v80_v30  ;;  %v1476_v29 = vld [vmem:[%s2293_s1 + $0x230] sm:$0xff]  ;;  %v82_v9 = vld [vmem:[%s2292_s0 + $0x238] sm:$0xff] }
  0x3c   :  { %512 = vst [vmem:[%s2294_s2 + $0x210] sm:$0xff] %v338_v39  ;;  %2348 = vst [vmem:[#allocation20_spill] sm:$0xff] %v1476_v29  ;;  %v1484_v25 = vld [vmem:[%s2293_s1 + $0x238] sm:$0xff]  ;;  %v342_v30 = vadd.f32 %v1476_v29, %v81_v63  ;;  %v83_v11 = vld [vmem:[%s2292_s0 + $0x240] sm:$0xff] }
  0x3d   :  { %2349 = vst [vmem:[#allocation21_spill] sm:$0xff] %v1484_v25  ;;  %513 = vst [vmem:[%s2294_s2 + $0x218] sm:$0xff] %v339_v56  ;;  %v343_v39 = vadd.f32 %v1484_v25, %v82_v9  ;;  %v1500_v50 = vld [vmem:[%s2293_s1 + $0x240] sm:$0xff]  ;;  %v84_v56 = vld [vmem:[%s2292_s0 + $0x248] sm:$0xff] }
  0x3e   :  { %514 = vst [vmem:[%s2294_s2 + $0x220] sm:$0xff] %v340_v61  ;;  %2350 = vst [vmem:[#allocation22_spill] sm:$0xff] %v1500_v50  ;;  %v344_v61 = vadd.f32 %v1500_v50, %v83_v11  ;;  %v1512_v63 = vld [vmem:[%s2293_s1 + $0x248] sm:$0xff]  ;;  %v85_v9 = vld [vmem:[%s2292_s0 + $0x250] sm:$0xff] }
  0x3f   :  { %515 = vst [vmem:[%s2294_s2 + $0x228] sm:$0xff] %v341_v43  ;;  %2351 = vst [vmem:[#allocation23_spill] sm:$0xff] %v1512_v63  ;;  %v1520_v25 = vld [vmem:[%s2293_s1 + $0x250] sm:$0xff]  ;;  %v345_v11 = vadd.f32 %v1512_v63, %v84_v56  ;;  %v86_v50 = vld [vmem:[%s2292_s0 + $0x258] sm:$0xff] }
  0x40   :  { %2352 = vst [vmem:[#allocation24_spill] sm:$0xff] %v1520_v25  ;;  %516 = vst [vmem:[%s2294_s2 + $0x230] sm:$0xff] %v342_v30  ;;  %v346_v43 = vadd.f32 %v1520_v25, %v85_v9  ;;  %v1536_v29 = vld [vmem:[%s2293_s1 + $0x258] sm:$0xff]  ;;  %v87_v30 = vld [vmem:[%s2292_s0 + $0x260] sm:$0xff] }
  0x41   :  { %517 = vst [vmem:[%s2294_s2 + $0x238] sm:$0xff] %v343_v39  ;;  %2353 = vst [vmem:[#allocation25_spill] sm:$0xff] %v1536_v29  ;;  %v347_v39 = vadd.f32 %v1536_v29, %v86_v50  ;;  %v1548_v56 = vld [vmem:[%s2293_s1 + $0x260] sm:$0xff]  ;;  %v88_v9 = vld [vmem:[%s2292_s0 + $0x268] sm:$0xff] }
  0x42   :  { %518 = vst [vmem:[%s2294_s2 + $0x240] sm:$0xff] %v344_v61  ;;  %2354 = vst [vmem:[#allocation26_spill] sm:$0xff] %v1548_v56  ;;  %v1556_v25 = vld [vmem:[%s2293_s1 + $0x268] sm:$0xff]  ;;  %v348_v50 = vadd.f32 %v1548_v56, %v87_v30  ;;  %v89_v29 = vld [vmem:[%s2292_s0 + $0x270] sm:$0xff] }
  0x43   :  { %2355 = vst [vmem:[#allocation27_spill] sm:$0xff] %v1556_v25  ;;  %519 = vst [vmem:[%s2294_s2 + $0x248] sm:$0xff] %v345_v11  ;;  %v349_v61 = vadd.f32 %v1556_v25, %v88_v9  ;;  %v1572_v63 = vld [vmem:[%s2293_s1 + $0x270] sm:$0xff]  ;;  %v90_v11 = vld [vmem:[%s2292_s0 + $0x278] sm:$0xff] }
  0x44   :  { %520 = vst [vmem:[%s2294_s2 + $0x250] sm:$0xff] %v346_v43  ;;  %2356 = vst [vmem:[#allocation28_spill] sm:$0xff] %v1572_v63  ;;  %v350_v43 = vadd.f32 %v1572_v63, %v89_v29  ;;  %v1584_v30 = vld [vmem:[%s2293_s1 + $0x278] sm:$0xff]  ;;  %v91_v9 = vld [vmem:[%s2292_s0 + $0x280] sm:$0xff] }
  0x45   :  { %521 = vst [vmem:[%s2294_s2 + $0x258] sm:$0xff] %v347_v39  ;;  %2357 = vst [vmem:[#allocation29_spill] sm:$0xff] %v1584_v30  ;;  %v1592_v25 = vld [vmem:[%s2293_s1 + $0x280] sm:$0xff]  ;;  %v351_v29 = vadd.f32 %v1584_v30, %v90_v11  ;;  %v92_v63 = vld [vmem:[%s2292_s0 + $0x288] sm:$0xff] }
  0x46   :  { %2358 = vst [vmem:[#allocation30_spill] sm:$0xff] %v1592_v25  ;;  %522 = vst [vmem:[%s2294_s2 + $0x260] sm:$0xff] %v348_v50  ;;  %v352_v39 = vadd.f32 %v1592_v25, %v91_v9  ;;  %v1608_v56 = vld [vmem:[%s2293_s1 + $0x288] sm:$0xff]  ;;  %v93_v50 = vld [vmem:[%s2292_s0 + $0x290] sm:$0xff] }
  0x47   :  { %523 = vst [vmem:[%s2294_s2 + $0x268] sm:$0xff] %v349_v61  ;;  %2359 = vst [vmem:[#allocation31_spill] sm:$0xff] %v1608_v56  ;;  %v353_v61 = vadd.f32 %v1608_v56, %v92_v63  ;;  %v1620_v11 = vld [vmem:[%s2293_s1 + $0x290] sm:$0xff]  ;;  %v94_v9 = vld [vmem:[%s2292_s0 + $0x298] sm:$0xff] }
  0x48   :  { %524 = vst [vmem:[%s2294_s2 + $0x270] sm:$0xff] %v350_v43  ;;  %2360 = vst [vmem:[#allocation32_spill] sm:$0xff] %v1620_v11  ;;  %v1628_v25 = vld [vmem:[%s2293_s1 + $0x298] sm:$0xff]  ;;  %v354_v63 = vadd.f32 %v1620_v11, %v93_v50  ;;  %v95_v56 = vld [vmem:[%s2292_s0 + $0x2a0] sm:$0xff] }
  0x49   :  { %2361 = vst [vmem:[#allocation33_spill] sm:$0xff] %v1628_v25  ;;  %525 = vst [vmem:[%s2294_s2 + $0x278] sm:$0xff] %v351_v29  ;;  %v355_v43 = vadd.f32 %v1628_v25, %v94_v9  ;;  %v1644_v30 = vld [vmem:[%s2293_s1 + $0x2a0] sm:$0xff]  ;;  %v96_v29 = vld [vmem:[%s2292_s0 + $0x2a8] sm:$0xff] }
  0x4a   :  { %526 = vst [vmem:[%s2294_s2 + $0x280] sm:$0xff] %v352_v39  ;;  %2362 = vst [vmem:[#allocation34_spill] sm:$0xff] %v1644_v30  ;;  %v356_v39 = vadd.f32 %v1644_v30, %v95_v56  ;;  %v1656_v50 = vld [vmem:[%s2293_s1 + $0x2a8] sm:$0xff]  ;;  %v97_v9 = vld [vmem:[%s2292_s0 + $0x2b0] sm:$0x3] }
  0x4b   :  { %527 = vst [vmem:[%s2294_s2 + $0x288] sm:$0xff] %v353_v61  ;;  %2363 = vst [vmem:[#allocation35_spill] sm:$0xff] %v1656_v50  ;;  %v1664_v25 = vld [vmem:[%s2293_s1 + $0x2b0] sm:$0x3]  ;;  %v357_v56 = vadd.f32 %v1656_v50, %v96_v29  ;;  %v98_v30 = vld [vmem:[%s2292_s0 + $0x2b8] sm:$0xff] }
  0x4c   :  { %2364 = vst [vmem:[#allocation36_spill] sm:$0xff] %v1664_v25  ;;  %528 = vst [vmem:[%s2294_s2 + $0x290] sm:$0xff] %v354_v63  ;;  %v358_v61 = vadd.f32 %v1664_v25, %v97_v9  ;;  %v99_v11 = vld [vmem:[%s2292_s0 + $0x2c0] sm:$0xff]  ;;  %v100_v63 = vld [vmem:[%s2292_s0 + $0x2c8] sm:$0xff] }
  0x4d   :  { %529 = vst [vmem:[%s2294_s2 + $0x298] sm:$0xff] %v355_v43  ;;  %530 = vst [vmem:[%s2294_s2 + $0x2a0] sm:$0xff] %v356_v39  ;;  %v359_v43 = vadd.f32 %v645_v1, %v98_v30  ;;  %v360_v29 = vadd.f32 %v654_v4, %v99_v11  ;;  %v361_v9 = vadd.f32 %v662_v6, %v100_v63  ;;  %v101_v25 = vld [vmem:[%s2292_s0 + $0x2d0] sm:$0xff]  ;;  %v102_v50 = vld [vmem:[%s2292_s0 + $0x2d8] sm:$0xff] }
  0x4e   :  { %v103_v20 = vld [vmem:[%s2292_s0 + $0x2e0] sm:$0xff]  ;;  %531 = vst [vmem:[%s2294_s2 + $0x2a8] sm:$0xff] %v357_v56  ;;  %532 = vst [vmem:[%s2294_s2 + $0x2b0] sm:$0x3] %v358_v61  ;;  %v362_v1 = vadd.f32 %v672_v10, %v101_v25  ;;  %v363_v4 = vadd.f32 %v684_v13, %v102_v50  ;;  %v104_v30 = vld [vmem:[%s2292_s0 + $0x2e8] sm:$0xff] }
  0x4f   :  { %v364_v6 = vadd.f32 %v692_v15, %v103_v20  ;;  %v105_v11 = vld [vmem:[%s2292_s0 + $0x2f0] sm:$0xff]  ;;  %v106_v39 = vld [vmem:[%s2292_s0 + $0x2f8] sm:$0xff]  ;;  %533 = vst [vmem:[%s2294_s2 + $0x2b8] sm:$0xff] %v359_v43  ;;  %534 = vst [vmem:[%s2294_s2 + $0x2c0] sm:$0xff] %v360_v29  ;;  %v365_v10 = vadd.f32 %v708_v19, %v104_v30 }
  0x50   :  { %535 = vst [vmem:[%s2294_s2 + $0x2c8] sm:$0xff] %v361_v9  ;;  %v366_v13 = vadd.f32 %v720_v22, %v105_v11  ;;  %v367_v15 = vadd.f32 %v728_v24, %v106_v39  ;;  %v107_v20 = vld [vmem:[%s2292_s0 + $0x300] sm:$0xff]  ;;  %v108_v25 = vld [vmem:[%s2292_s0 + $0x308] sm:$0xff]  ;;  %v109_v50 = vld [vmem:[%s2292_s0 + $0x310] sm:$0xff] }
  0x51   :  { %536 = vst [vmem:[%s2294_s2 + $0x2d0] sm:$0xff] %v362_v1  ;;  %537 = vst [vmem:[%s2294_s2 + $0x2d8] sm:$0xff] %v363_v4  ;;  %v368_v19 = vadd.f32 %v744_v28, %v107_v20  ;;  %v369_v22 = vadd.f32 %v756_v31, %v108_v25  ;;  %v370_v24 = vadd.f32 %v764_v33, %v109_v50  ;;  %v110_v56 = vld [vmem:[%s2292_s0 + $0x318] sm:$0xff]  ;;  %v111_v61 = vld [vmem:[%s2292_s0 + $0x320] sm:$0xff] }
  0x52   :  { %538 = vst [vmem:[%s2294_s2 + $0x2e0] sm:$0xff] %v364_v6  ;;  %v112_v63 = vld [vmem:[%s2292_s0 + $0x328] sm:$0xff]  ;;  %539 = vst [vmem:[%s2294_s2 + $0x2e8] sm:$0xff] %v365_v10  ;;  %v371_v28 = vadd.f32 %v780_v37, %v110_v56  ;;  %v372_v31 = vadd.f32 %v792_v40, %v111_v61  ;;  %v113_v43 = vld [vmem:[%s2292_s0 + $0x330] sm:$0xff] }
  0x53   :  { %540 = vst [vmem:[%s2294_s2 + $0x2f0] sm:$0xff] %v366_v13  ;;  %541 = vst [vmem:[%s2294_s2 + $0x2f8] sm:$0xff] %v367_v15  ;;  %v373_v33 = vadd.f32 %v800_v42, %v112_v63  ;;  %v114_v29 = vld [vmem:[%s2292_s0 + $0x338] sm:$0xff]  ;;  %v115_v9 = vld [vmem:[%s2292_s0 + $0x340] sm:$0xff]  ;;  %v374_v37 = vadd.f32 %v816_v46, %v113_v43 }
  0x54   :  { %542 = vst [vmem:[%s2294_s2 + $0x300] sm:$0xff] %v368_v19  ;;  %543 = vst [vmem:[%s2294_s2 + $0x308] sm:$0xff] %v369_v22  ;;  %v375_v40 = vadd.f32 %v828_v49, %v114_v29  ;;  %v376_v42 = vadd.f32 %v836_v51, %v115_v9  ;;  %v116_v1 = vld [vmem:[%s2292_s0 + $0x348] sm:$0xff]  ;;  %v117_v4 = vld [vmem:[%s2292_s0 + $0x350] sm:$0xff] }
  0x55   :  { %544 = vst [vmem:[%s2294_s2 + $0x310] sm:$0xff] %v370_v24  ;;  %v118_v6 = vld [vmem:[%s2292_s0 + $0x358] sm:$0xff]  ;;  %545 = vst [vmem:[%s2294_s2 + $0x318] sm:$0xff] %v371_v28  ;;  %v377_v46 = vadd.f32 %v852_v55, %v116_v1  ;;  %v378_v49 = vadd.f32 %v864_v58, %v117_v4  ;;  %v119_v30 = vld [vmem:[%s2292_s0 + $0x360] sm:$0xff] }
  0x56   :  { %546 = vst [vmem:[%s2294_s2 + $0x320] sm:$0xff] %v372_v31  ;;  %547 = vst [vmem:[%s2294_s2 + $0x328] sm:$0xff] %v373_v33  ;;  %v379_v51 = vadd.f32 %v872_v60, %v118_v6  ;;  %v120_v11 = vld [vmem:[%s2292_s0 + $0x368] sm:$0xff]  ;;  %v121_v39 = vld [vmem:[%s2292_s0 + $0x370] sm:$0xff]  ;;  %v380_v55 = vadd.f32 %v888_v0, %v119_v30 }
  0x57   :  { %548 = vst [vmem:[%s2294_s2 + $0x330] sm:$0xff] %v374_v37  ;;  %549 = vst [vmem:[%s2294_s2 + $0x338] sm:$0xff] %v375_v40  ;;  %v381_v58 = vadd.f32 %v900_v5, %v120_v11  ;;  %v382_v60 = vadd.f32 %v908_v8, %v121_v39  ;;  %v122_v10 = vld [vmem:[%s2292_s0 + $0x378] sm:$0xff]  ;;  %v123_v13 = vld [vmem:[%s2292_s0 + $0x380] sm:$0xff] }
  0x58   :  { %550 = vst [vmem:[%s2294_s2 + $0x340] sm:$0xff] %v376_v42  ;;  %v124_v15 = vld [vmem:[%s2292_s0 + $0x388] sm:$0xff]  ;;  %551 = vst [vmem:[%s2294_s2 + $0x348] sm:$0xff] %v377_v46  ;;  %v383_v0 = vadd.f32 %v924_v14, %v122_v10  ;;  %v384_v5 = vadd.f32 %v936_v18, %v123_v13  ;;  %v125_v20 = vld [vmem:[%s2292_s0 + $0x390] sm:$0xff] }
  0x59   :  { %552 = vst [vmem:[%s2294_s2 + $0x350] sm:$0xff] %v378_v49  ;;  %553 = vst [vmem:[%s2294_s2 + $0x358] sm:$0xff] %v379_v51  ;;  %v385_v8 = vadd.f32 %v944_v21, %v124_v15  ;;  %v126_v25 = vld [vmem:[%s2292_s0 + $0x398] sm:$0xff]  ;;  %v127_v50 = vld [vmem:[%s2292_s0 + $0x3a0] sm:$0xff]  ;;  %v386_v14 = vadd.f32 %v960_v27, %v125_v20 }
  0x5a   :  { %554 = vst [vmem:[%s2294_s2 + $0x360] sm:$0xff] %v380_v55  ;;  %555 = vst [vmem:[%s2294_s2 + $0x368] sm:$0xff] %v381_v58  ;;  %v387_v18 = vadd.f32 %v972_v32, %v126_v25  ;;  %v388_v21 = vadd.f32 %v980_v35, %v127_v50  ;;  %v128_v19 = vld [vmem:[%s2292_s0 + $0x3a8] sm:$0xff]  ;;  %v129_v22 = vld [vmem:[%s2292_s0 + $0x3b0] sm:$0xff] }
  0x5b   :  { %556 = vst [vmem:[%s2294_s2 + $0x370] sm:$0xff] %v382_v60  ;;  %v130_v24 = vld [vmem:[%s2292_s0 + $0x3b8] sm:$0xff]  ;;  %557 = vst [vmem:[%s2294_s2 + $0x378] sm:$0xff] %v383_v0  ;;  %v389_v27 = vadd.f32 %v996_v41, %v128_v19  ;;  %v390_v32 = vadd.f32 %v1008_v45, %v129_v22  ;;  %v131_v56 = vld [vmem:[%s2292_s0 + $0x3c0] sm:$0xff] }
  0x5c   :  { %558 = vst [vmem:[%s2294_s2 + $0x380] sm:$0xff] %v384_v5  ;;  %559 = vst [vmem:[%s2294_s2 + $0x388] sm:$0xff] %v385_v8  ;;  %v391_v35 = vadd.f32 %v1016_v48, %v130_v24  ;;  %v132_v61 = vld [vmem:[%s2292_s0 + $0x3c8] sm:$0xff]  ;;  %v133_v63 = vld [vmem:[%s2292_s0 + $0x3d0] sm:$0xff]  ;;  %v392_v41 = vadd.f32 %v1032_v54, %v131_v56 }
  0x5d   :  { %560 = vst [vmem:[%s2294_s2 + $0x390] sm:$0xff] %v386_v14  ;;  %561 = vst [vmem:[%s2294_s2 + $0x398] sm:$0xff] %v387_v18  ;;  %v393_v45 = vadd.f32 %v1044_v59, %v132_v61  ;;  %v394_v48 = vadd.f32 %v1052_v62, %v133_v63  ;;  %v134_v28 = vld [vmem:[%s2292_s0 + $0x3d8] sm:$0xff]  ;;  %v135_v31 = vld [vmem:[%s2292_s0 + $0x3e0] sm:$0xff] }
  0x5e   :  { %562 = vst [vmem:[%s2294_s2 + $0x3a0] sm:$0xff] %v388_v21  ;;  %v136_v33 = vld [vmem:[%s2292_s0 + $0x3e8] sm:$0xff]  ;;  %563 = vst [vmem:[%s2294_s2 + $0x3a8] sm:$0xff] %v389_v27  ;;  %v395_v54 = vadd.f32 %v1068_v7, %v134_v28  ;;  %v396_v59 = vadd.f32 %v1080_v12, %v135_v31  ;;  %v137_v43 = vld [vmem:[%s2292_s0 + $0x3f0] sm:$0xff] }
  0x5f   :  { %564 = vst [vmem:[%s2294_s2 + $0x3b0] sm:$0xff] %v390_v32  ;;  %565 = vst [vmem:[%s2294_s2 + $0x3b8] sm:$0xff] %v391_v35  ;;  %v397_v62 = vadd.f32 %v1088_v17, %v136_v33  ;;  %v138_v29 = vld [vmem:[%s2292_s0 + $0x3f8] sm:$0xff]  ;;  %v139_v9 = vld [vmem:[%s2292_s0 + $0x400] sm:$0xff]  ;;  %v398_v7 = vadd.f32 %v1104_v26, %v137_v43 }
  0x60   :  { %566 = vst [vmem:[%s2294_s2 + $0x3c0] sm:$0xff] %v392_v41  ;;  %567 = vst [vmem:[%s2294_s2 + $0x3c8] sm:$0xff] %v393_v45  ;;  %v399_v12 = vadd.f32 %v1116_v34, %v138_v29  ;;  %v400_v17 = vadd.f32 %v1124_v38, %v139_v9  ;;  %v140_v37 = vld [vmem:[%s2292_s0 + $0x408] sm:$0xff]  ;;  %v141_v40 = vld [vmem:[%s2292_s0 + $0x410] sm:$0xff] }
  0x61   :  { %568 = vst [vmem:[%s2294_s2 + $0x3d0] sm:$0xff] %v394_v48  ;;  %v142_v42 = vld [vmem:[%s2292_s0 + $0x418] sm:$0xff]  ;;  %569 = vst [vmem:[%s2294_s2 + $0x3d8] sm:$0xff] %v395_v54  ;;  %v401_v26 = vadd.f32 %v1140_v47, %v140_v37  ;;  %v402_v34 = vadd.f32 %v1152_v53, %v141_v40  ;;  %v143_v1 = vld [vmem:[%s2292_s0 + $0x420] sm:$0xff] }
  0x62   :  { %570 = vst [vmem:[%s2294_s2 + $0x3e0] sm:$0xff] %v396_v59  ;;  %571 = vst [vmem:[%s2294_s2 + $0x3e8] sm:$0xff] %v397_v62  ;;  %v403_v38 = vadd.f32 %v1160_v57, %v142_v42  ;;  %v144_v4 = vld [vmem:[%s2292_s0 + $0x428] sm:$0xff]  ;;  %v145_v6 = vld [vmem:[%s2292_s0 + $0x430] sm:$0xff]  ;;  %v404_v47 = vadd.f32 %v1176_v3, %v143_v1 }
  0x63   :  { %572 = vst [vmem:[%s2294_s2 + $0x3f0] sm:$0xff] %v398_v7  ;;  %573 = vst [vmem:[%s2294_s2 + $0x3f8] sm:$0xff] %v399_v12  ;;  %v405_v53 = vadd.f32 %v1188_v16, %v144_v4  ;;  %v406_v57 = vadd.f32 %v1196_v23, %v145_v6  ;;  %v146_v46 = vld [vmem:[%s2292_s0 + $0x438] sm:$0xff]  ;;  %v147_v49 = vld [vmem:[%s2292_s0 + $0x440] sm:$0xff] }
  0x64   :  { %574 = vst [vmem:[%s2294_s2 + $0x400] sm:$0xff] %v400_v17  ;;  %v148_v51 = vld [vmem:[%s2292_s0 + $0x448] sm:$0xff]  ;;  %575 = vst [vmem:[%s2294_s2 + $0x408] sm:$0xff] %v401_v26  ;;  %v407_v3 = vadd.f32 %v1212_v36, %v146_v46  ;;  %v408_v16 = vadd.f32 %v1224_v44, %v147_v49  ;;  %v149_v30 = vld [vmem:[%s2292_s0 + $0x450] sm:$0xff] }
  0x65   :  { %576 = vst [vmem:[%s2294_s2 + $0x410] sm:$0xff] %v402_v34  ;;  %577 = vst [vmem:[%s2294_s2 + $0x418] sm:$0xff] %v403_v38  ;;  %v409_v23 = vadd.f32 %v1232_v52, %v148_v51  ;;  %v150_v11 = vld [vmem:[%s2292_s0 + $0x458] sm:$0xff]  ;;  %v151_v39 = vld [vmem:[%s2292_s0 + $0x460] sm:$0xff]  ;;  %v410_v36 = vadd.f32 %v1248_v2, %v149_v30 }
  0x66   :  { %578 = vst [vmem:[%s2294_s2 + $0x420] sm:$0xff] %v404_v47  ;;  %579 = vst [vmem:[%s2294_s2 + $0x428] sm:$0xff] %v405_v53  ;;  %v2365_v44 = vld [vmem:[#allocation2_spill] sm:$0xff]  ;;  %v2366_v55 = vld [vmem:[#allocation3_spill] sm:$0xff] }
  0x67   :  { %580 = vst [vmem:[%s2294_s2 + $0x430] sm:$0xff] %v406_v57  ;;  %v411_v52 = vadd.f32 %v2365_v44, %v150_v11  ;;  %v412_v58 = vadd.f32 %v2366_v55, %v151_v39  ;;  %v152_v60 = vld [vmem:[%s2292_s0 + $0x468] sm:$0xff]  ;;  %v153_v10 = vld [vmem:[%s2292_s0 + $0x470] sm:$0xff]  ;;  %v154_v13 = vld [vmem:[%s2292_s0 + $0x478] sm:$0xff] }
  0x68   :  { %581 = vst [vmem:[%s2294_s2 + $0x438] sm:$0xff] %v407_v3  ;;  %582 = vst [vmem:[%s2294_s2 + $0x440] sm:$0xff] %v408_v16  ;;  %v2367_v2 = vld [vmem:[#allocation4_spill] sm:$0xff]  ;;  %v2368_v0 = vld [vmem:[#allocation5_spill] sm:$0xff] }
  0x69   :  { %583 = vst [vmem:[%s2294_s2 + $0x448] sm:$0xff] %v409_v23  ;;  %v413_v15 = vadd.f32 %v2367_v2, %v152_v60  ;;  %v414_v5 = vadd.f32 %v2368_v0, %v153_v10  ;;  %v2369_v8 = vld [vmem:[#allocation6_spill] sm:$0xff]  ;;  %v156_v50 = vld [vmem:[%s2292_s0 + $0x488] sm:$0xff]  ;;  %v157_v14 = vld [vmem:[%s2292_s0 + $0x490] sm:$0xff] }
  0x6a   :  { %v415_v20 = vadd.f32 %v2369_v8, %v154_v13  ;;  %v155_v25 = vld [vmem:[%s2292_s0 + $0x480] sm:$0xff]  ;;  %584 = vst [vmem:[%s2294_s2 + $0x450] sm:$0xff] %v410_v36  ;;  %585 = vst [vmem:[%s2294_s2 + $0x458] sm:$0xff] %v411_v52  ;;  %v2370_v18 = vld [vmem:[#allocation7_spill] sm:$0xff] }
  0x6b   :  { %586 = vst [vmem:[%s2294_s2 + $0x460] sm:$0xff] %v412_v58  ;;  %v416_v21 = vadd.f32 %v2370_v18, %v155_v25  ;;  %v2371_v19 = vld [vmem:[#allocation8_spill] sm:$0xff]  ;;  %v2372_v24 = vld [vmem:[#allocation9_spill] sm:$0xff]  ;;  %v159_v35 = vld [vmem:[%s2292_s0 + $0x4a0] sm:$0xff] }
  0x6c   :  { %v417_v22 = vadd.f32 %v2371_v19, %v156_v50  ;;  %v418_v27 = vadd.f32 %v2372_v24, %v157_v14  ;;  %v158_v32 = vld [vmem:[%s2292_s0 + $0x498] sm:$0xff]  ;;  %v160_v56 = vld [vmem:[%s2292_s0 + $0x4a8] sm:$0xff]  ;;  %587 = vst [vmem:[%s2294_s2 + $0x468] sm:$0xff] %v413_v15  ;;  %588 = vst [vmem:[%s2294_s2 + $0x470] sm:$0xff] %v414_v5 }
  0x6d   :  { %589 = vst [vmem:[%s2294_s2 + $0x478] sm:$0xff] %v415_v20  ;;  %v2373_v61 = vld [vmem:[#allocation10_spill] sm:$0xff]  ;;  %v2374_v41 = vld [vmem:[#allocation11_spill] sm:$0xff]  ;;  %v2375_v48 = vld [vmem:[#allocation12_spill] sm:$0xff] }
  0x6e   :  { %v419_v63 = vadd.f32 %v2373_v61, %v158_v32  ;;  %v420_v45 = vadd.f32 %v2374_v41, %v159_v35  ;;  %v421_v28 = vadd.f32 %v2375_v48, %v160_v56  ;;  %v161_v31 = vld [vmem:[%s2292_s0 + $0x4b0] sm:$0xff]  ;;  %v162_v33 = vld [vmem:[%s2292_s0 + $0x4b8] sm:$0xff]  ;;  %v163_v54 = vld [vmem:[%s2292_s0 + $0x4c0] sm:$0xff]  ;;  %590 = vst [vmem:[%s2294_s2 + $0x480] sm:$0xff] %v416_v21 }
  0x6f   :  { %591 = vst [vmem:[%s2294_s2 + $0x488] sm:$0xff] %v417_v22  ;;  %592 = vst [vmem:[%s2294_s2 + $0x490] sm:$0xff] %v418_v27  ;;  %v2376_v59 = vld [vmem:[#allocation13_spill] sm:$0xff]  ;;  %v2377_v43 = vld [vmem:[#allocation14_spill] sm:$0xff] }
  0x70   :  { %v422_v62 = vadd.f32 %v2376_v59, %v161_v31  ;;  %v423_v29 = vadd.f32 %v2377_v43, %v162_v33  ;;  %v2378_v9 = vld [vmem:[#allocation15_spill] sm:$0xff]  ;;  %v165_v17 = vld [vmem:[%s2292_s0 + $0x4d0] sm:$0xff]  ;;  %v166_v37 = vld [vmem:[%s2292_s0 + $0x4d8] sm:$0xff]  ;;  %593 = vst [vmem:[%s2294_s2 + $0x498] sm:$0xff] %v419_v63 }
  0x71   :  { %v424_v7 = vadd.f32 %v2378_v9, %v163_v54  ;;  %v164_v12 = vld [vmem:[%s2292_s0 + $0x4c8] sm:$0xff]  ;;  %594 = vst [vmem:[%s2294_s2 + $0x4a0] sm:$0xff] %v420_v45  ;;  %595 = vst [vmem:[%s2294_s2 + $0x4a8] sm:$0xff] %v421_v28  ;;  %v2379_v40 = vld [vmem:[#allocation16_spill] sm:$0xff] }
  0x72   :  { %v425_v42 = vadd.f32 %v2379_v40, %v164_v12  ;;  %v2380_v26 = vld [vmem:[#allocation17_spill] sm:$0xff]  ;;  %v2381_v38 = vld [vmem:[#allocation18_spill] sm:$0xff]  ;;  %v168_v6 = vld [vmem:[%s2292_s0 + $0x4e8] sm:$0xff]  ;;  %596 = vst [vmem:[%s2294_s2 + $0x4b0] sm:$0xff] %v422_v62 }
  0x73   :  { %v426_v34 = vadd.f32 %v2380_v26, %v165_v17  ;;  %v427_v1 = vadd.f32 %v2381_v38, %v166_v37  ;;  %v167_v4 = vld [vmem:[%s2292_s0 + $0x4e0] sm:$0xff]  ;;  %v169_v47 = vld [vmem:[%s2292_s0 + $0x4f0] sm:$0xff]  ;;  %597 = vst [vmem:[%s2294_s2 + $0x4b8] sm:$0xff] %v423_v29  ;;  %598 = vst [vmem:[%s2294_s2 + $0x4c0] sm:$0xff] %v424_v7 }
  0x74   :  { %v2382_v53 = vld [vmem:[#allocation19_spill] sm:$0xff]  ;;  %v2383_v46 = vld [vmem:[#allocation20_spill] sm:$0xff]  ;;  %v2384_v51 = vld [vmem:[#allocation21_spill] sm:$0xff]  ;;  %599 = vst [vmem:[%s2294_s2 + $0x4c8] sm:$0xff] %v425_v42 }
  0x75   :  { %v428_v57 = vadd.f32 %v2382_v53, %v167_v4  ;;  %v429_v49 = vadd.f32 %v2383_v46, %v168_v6  ;;  %v430_v3 = vadd.f32 %v2384_v51, %v169_v47  ;;  %v170_v16 = vld [vmem:[%s2292_s0 + $0x4f8] sm:$0xff]  ;;  %v171_v23 = vld [vmem:[%s2292_s0 + $0x500] sm:$0xff]  ;;  %v172_v30 = vld [vmem:[%s2292_s0 + $0x508] sm:$0xff]  ;;  %600 = vst [vmem:[%s2294_s2 + $0x4d0] sm:$0xff] %v426_v34 }
  0x76   :  { %601 = vst [vmem:[%s2294_s2 + $0x4d8] sm:$0xff] %v427_v1  ;;  %v2385_v11 = vld [vmem:[#allocation22_spill] sm:$0xff]  ;;  %v2386_v36 = vld [vmem:[#allocation23_spill] sm:$0xff]  ;;  %v2387_v52 = vld [vmem:[#allocation24_spill] sm:$0xff] }
  0x77   :  { %v431_v39 = vadd.f32 %v2385_v11, %v170_v16  ;;  %v432_v44 = vadd.f32 %v2386_v36, %v171_v23  ;;  %v433_v55 = vadd.f32 %v2387_v52, %v172_v30  ;;  %v173_v58 = vld [vmem:[%s2292_s0 + $0x510] sm:$0xff]  ;;  %v174_v60 = vld [vmem:[%s2292_s0 + $0x518] sm:$0xff]  ;;  %v175_v10 = vld [vmem:[%s2292_s0 + $0x520] sm:$0xff]  ;;  %602 = vst [vmem:[%s2294_s2 + $0x4e0] sm:$0xff] %v428_v57 }
  0x78   :  { %603 = vst [vmem:[%s2294_s2 + $0x4e8] sm:$0xff] %v429_v49  ;;  %604 = vst [vmem:[%s2294_s2 + $0x4f0] sm:$0xff] %v430_v3  ;;  %v2388_v13 = vld [vmem:[#allocation25_spill] sm:$0xff]  ;;  %v2389_v15 = vld [vmem:[#allocation26_spill] sm:$0xff] }
  0x79   :  { %v434_v2 = vadd.f32 %v2388_v13, %v173_v58  ;;  %v435_v0 = vadd.f32 %v2389_v15, %v174_v60  ;;  %v2390_v5 = vld [vmem:[#allocation27_spill] sm:$0xff]  ;;  %v177_v25 = vld [vmem:[%s2292_s0 + $0x530] sm:$0xff]  ;;  %v178_v50 = vld [vmem:[%s2292_s0 + $0x538] sm:$0xff]  ;;  %605 = vst [vmem:[%s2294_s2 + $0x4f8] sm:$0xff] %v431_v39 }
  0x7a   :  { %v436_v8 = vadd.f32 %v2390_v5, %v175_v10  ;;  %v176_v20 = vld [vmem:[%s2292_s0 + $0x528] sm:$0xff]  ;;  %606 = vst [vmem:[%s2294_s2 + $0x500] sm:$0xff] %v432_v44  ;;  %607 = vst [vmem:[%s2294_s2 + $0x508] sm:$0xff] %v433_v55  ;;  %v2391_v14 = vld [vmem:[#allocation28_spill] sm:$0xff] }
  0x7b   :  { %v437_v18 = vadd.f32 %v2391_v14, %v176_v20  ;;  %v2392_v21 = vld [vmem:[#allocation29_spill] sm:$0xff]  ;;  %v2393_v22 = vld [vmem:[#allocation30_spill] sm:$0xff]  ;;  %v180_v32 = vld [vmem:[%s2292_s0 + $0x548] sm:$0xff]  ;;  %608 = vst [vmem:[%s2294_s2 + $0x510] sm:$0xff] %v434_v2 }
  0x7c   :  { %v438_v19 = vadd.f32 %v2392_v21, %v177_v25  ;;  %v439_v24 = vadd.f32 %v2393_v22, %v178_v50  ;;  %v179_v27 = vld [vmem:[%s2292_s0 + $0x540] sm:$0xff]  ;;  %v181_v35 = vld [vmem:[%s2292_s0 + $0x550] sm:$0xff]  ;;  %609 = vst [vmem:[%s2294_s2 + $0x518] sm:$0xff] %v435_v0  ;;  %610 = vst [vmem:[%s2294_s2 + $0x520] sm:$0xff] %v436_v8 }
  0x7d   :  { %v2394_v56 = vld [vmem:[#allocation31_spill] sm:$0xff]  ;;  %v2395_v63 = vld [vmem:[#allocation32_spill] sm:$0xff]  ;;  %v2396_v45 = vld [vmem:[#allocation33_spill] sm:$0xff]  ;;  %611 = vst [vmem:[%s2294_s2 + $0x528] sm:$0xff] %v437_v18 }
  0x7e   :  { %v440_v61 = vadd.f32 %v2394_v56, %v179_v27  ;;  %v441_v41 = vadd.f32 %v2395_v63, %v180_v32  ;;  %v442_v48 = vadd.f32 %v2396_v45, %v181_v35  ;;  %v182_v28 = vld [vmem:[%s2292_s0 + $0x558] sm:$0xff]  ;;  %v183_v31 = vld [vmem:[%s2292_s0 + $0x560] sm:$0xff]  ;;  %v184_v33 = vld [vmem:[%s2292_s0 + $0x568] sm:$0x3]  ;;  %612 = vst [vmem:[%s2294_s2 + $0x530] sm:$0xff] %v438_v19 }
  0x7f   :  { %613 = vst [vmem:[%s2294_s2 + $0x538] sm:$0xff] %v439_v24  ;;  %v2397_v54 = vld [vmem:[#allocation34_spill] sm:$0xff]  ;;  %v2398_v62 = vld [vmem:[#allocation35_spill] sm:$0xff]  ;;  %v2399_v29 = vld [vmem:[#allocation36_spill] sm:$0xff] }
  0x80   :  { %v443_v59 = vadd.f32 %v2397_v54, %v182_v28  ;;  %v444_v43 = vadd.f32 %v2398_v62, %v183_v31  ;;  %v445_v9 = vadd.f32 %v2399_v29, %v184_v33  ;;  %614 = vst [vmem:[%s2294_s2 + $0x540] sm:$0xff] %v440_v61  ;;  %615 = vst [vmem:[%s2294_s2 + $0x548] sm:$0xff] %v441_v41 }
  0x81   :  { %616 = vst [vmem:[%s2294_s2 + $0x550] sm:$0xff] %v442_v48 }
  0x82   :  { %617 = vst [vmem:[%s2294_s2 + $0x558] sm:$0xff] %v443_v59  ;;  %618 = vst [vmem:[%s2294_s2 + $0x560] sm:$0xff] %v444_v43 }
  0x83   :  { %619 = vst [vmem:[%s2294_s2 + $0x568] sm:$0x3] %v445_v9 }

</bundles_post_ra>
